<compile_context>
chip_gen: v6e
topology: v6e:2x2x1
jax: 0.10.0
libtpu: 0.0.40
codegen_flags: <defaults>
</compile_context>

<pallas_src>
import jax
import jax.numpy as jnp
from jax.experimental import pallas as pl
from jax.experimental.pallas import tpu as pltpu


def _round_up(x, m):
    return (x + m - 1) // m * m


def _pick_lane_tile(m, max_tile):
    """Lane-tile size: multiple of 128, as large as allowed, but >= 2 grid steps
    whenever m permits (so v7x's two TensorCores both get work)."""
    half = _round_up(-(-m // 2), 128)
    return max(128, min(max_tile, half))


# ----------------------------------------------------------------------------
# Pallas kernels
# ----------------------------------------------------------------------------
def _conv_relu_pool_kernel(w_ref, b_ref, xt_ref, o_ref):
    """Fused conv(as matmul) + bias + ReLU + 2x2 max-pool, channel-major.

    w_ref : (Cp, Kp)        bf16  conv weight, rows = output channels
    b_ref : (Cp, 1)         f32   bias
    xt_ref: (Kp, 4*TM)      bf16  im2col patches; the 4 pooling candidates are
                                  blocked contiguously along the lane axis
    o_ref : (Cp, TM)        bf16  pooled activations (lane-dense)
    """
    tm = o_ref.shape[-1]
    # One long MXU stream over 4*TM lanes (instead of 4 small matmuls).
    acc = jnp.dot(w_ref[...], xt_ref[...], preferred_element_type=jnp.float32)
    m01 = jnp.maximum(acc[:, 0 * tm:1 * tm], acc[:, 1 * tm:2 * tm])
    m23 = jnp.maximum(acc[:, 2 * tm:3 * tm], acc[:, 3 * tm:4 * tm])
    pooled = jnp.maximum(m01, m23)
    # max_c(relu(y_c + b)) == relu(max_c(y_c) + b)  (bias-add / ReLU are monotone)
    o_ref[...] = jnp.maximum(pooled + b_ref[...], 0.0).astype(o_ref.dtype)


def _fc_chain_kernel(x_ref, w1_ref, b1_ref, w2_ref, b2_ref, w3_ref, b3_ref,
                     o_ref):
    """Fused fc1+ReLU -> fc2+ReLU -> fc3; weights stay VMEM resident.

    x_ref : (K1p, TB) bf16   flattened features, transposed (lanes = batch)
    wX_ref: (Np, Kp)  bf16   pre-padded weights (PyTorch (out, in) layout)
    bX_ref: (Np, 1)   f32
    o_ref : (N3p, TB) f32    logits (padded rows are zero)
    """
    h = jnp.dot(w1_ref[...], x_ref[...], preferred_element_type=jnp.float32)
    h = jnp.maximum(h + b1_ref[...], 0.0).astype(jnp.bfloat16)
    h = jnp.dot(w2_ref[...], h, preferred_element_type=jnp.float32)
    h = jnp.maximum(h + b2_ref[...], 0.0).astype(jnp.bfloat16)
    o = jnp.dot(w3_ref[...], h, preferred_element_type=jnp.float32)
    o_ref[...] = o + b3_ref[...]


# ----------------------------------------------------------------------------
# Wrappers around pallas_call
# ----------------------------------------------------------------------------
def _im2col_pooled(x_cm, kh, kw, Kp, n_tiles, tm, m_order):
    """x_cm: (C, B, H, W) bf16 channel-major -> (Kp, n_tiles*4*tm) bf16 im2col.

    Columns are ordered (grid tile, pool candidate, within-tile m) so each grid
    step reads one contiguous (Kp, 4*tm) block.  K ordering is c*(kh*kw)+i*kw+j,
    matching PyTorch's weight.reshape(Cout, -1).  m_order selects the M layout:
      "bhw": M index = b*(Hp*Wp) + hp*Wp + wp   (conv1 -> conv2 input)
      "hwb": M index = (hp*Wp + wp)*B + b       (conv2 -> contiguous FC flatten)
    """
    C, B, H, W = x_cm.shape
    Ho, Wo = H - kh + 1, W - kw + 1
    Hp, Wp = Ho // 2, Wo // 2
    cols = [x_cm[:, :, i:i + Ho, j:j + Wo]
            for i in range(kh) for j in range(kw)]
    p = jnp.stack(cols, axis=1)                        # (C, kh*kw, B, Ho, Wo)
    p = p.reshape(C, kh * kw, B, Hp, 2, Wp, 2)
    if m_order == "bhw":
        p = p.transpose(4, 6, 0, 1, 2, 3, 5)           # (2, 2, C, khkw, B, Hp, Wp)
    else:                                              # "hwb"
        p = p.transpose(4, 6, 0, 1, 3, 5, 2)           # (2, 2, C, khkw, Hp, Wp, B)
    K = C * kh * kw
    M = B * Hp * Wp
    p = p.reshape(4, K, M)
    Mp = n_tiles * tm
    p = jnp.pad(p, ((0, 0), (0, Kp - K), (0, Mp - M)))
    # Candidates onto the lane axis, blocked per grid tile.
    p = p.reshape(4, Kp, n_tiles, tm)
    p = p.transpose(1, 2, 0, 3).reshape(Kp, n_tiles * 4 * tm)
    return p


def conv_relu_pool(x_cm, w_p, b_p, kh=5, kw=5, m_order="bhw"):
    """x_cm: (C, B, H, W) bf16 -> pooled activations, channel-major.

    Returns (Cp, B, Hp, Wp) for m_order="bhw", (Cp, Hp*Wp, B) for "hwb".
    """
    C, B, H, W = x_cm.shape
    Cp, Kp = w_p.shape
    Ho, Wo = H - kh + 1, W - kw + 1
    Hp, Wp = Ho // 2, Wo // 2
    M = B * Hp * Wp
    TM = _pick_lane_tile(M, 2048)
    n_tiles = -(-M // TM)
    Mp = n_tiles * TM
    xt = _im2col_pooled(x_cm, kh, kw, Kp, n_tiles, TM, m_order)

    y = pl.pallas_call(
        _conv_relu_pool_kernel,
        out_shape=jax.ShapeDtypeStruct((Cp, Mp), jnp.bfloat16),
        grid=(n_tiles,),
        in_specs=[
            pl.BlockSpec((Cp, Kp), lambda i: (0, 0)),
            pl.BlockSpec((Cp, 1), lambda i: (0, 0)),
            pl.BlockSpec((Kp, 4 * TM), lambda i: (0, i)),
        ],
        out_specs=pl.BlockSpec((Cp, TM), lambda i: (0, i)),
        compiler_params=pltpu.CompilerParams(
            dimension_semantics=("parallel",),
            vmem_limit_bytes=32 * 1024 * 1024),
    )(w_p, b_p, xt)

    y = y[:, :M]   # padded columns hold relu(bias); slice them off.
    if m_order == "bhw":
        return y.reshape(Cp, B, Hp, Wp)
    return y.reshape(Cp, Hp * Wp, B)


def fc_chain(x_t, pp):
    """x_t: (K1, B) bf16 flattened features -> (B, 10) f32 logits (one kernel)."""
    K1, B = x_t.shape
    K1p = pp["fc1_w"].shape[1]
    TB = _pick_lane_tile(B, 512)
    n_tiles = -(-B // TB)
    Bp = n_tiles * TB
    x_p = jnp.pad(x_t, ((0, K1p - K1), (0, Bp - B)))
    n3p = pp["fc3_w"].shape[0]

    out = pl.pallas_call(
        _fc_chain_kernel,
        out_shape=jax.ShapeDtypeStruct((n3p, Bp), jnp.float32),
        grid=(n_tiles,),
        in_specs=[
            pl.BlockSpec((K1p, TB), lambda i: (0, i)),
            pl.BlockSpec(pp["fc1_w"].shape, lambda i: (0, 0)),
            pl.BlockSpec(pp["fc1_b"].shape, lambda i: (0, 0)),
            pl.BlockSpec(pp["fc2_w"].shape, lambda i: (0, 0)),
            pl.BlockSpec(pp["fc2_b"].shape, lambda i: (0, 0)),
            pl.BlockSpec(pp["fc3_w"].shape, lambda i: (0, 0)),
            pl.BlockSpec(pp["fc3_b"].shape, lambda i: (0, 0)),
        ],
        out_specs=pl.BlockSpec((n3p, TB), lambda i: (0, i)),
        compiler_params=pltpu.CompilerParams(
            dimension_semantics=("parallel",),
            vmem_limit_bytes=32 * 1024 * 1024),
    )(x_p, pp["fc1_w"], pp["fc1_b"], pp["fc2_w"], pp["fc2_b"],
      pp["fc3_w"], pp["fc3_b"])
    return out[:10, :B].T


# ----------------------------------------------------------------------------
# Model: parameters, one-time weight preparation, forward (cifar, quantize=False)
# ----------------------------------------------------------------------------
def init_params(key):
    def _uniform(key, shape, fan_in):
        bound = 1.0 / jnp.sqrt(jnp.asarray(fan_in, jnp.float32))
        return jax.random.uniform(key, shape, jnp.float32, -bound, bound)

    keys = jax.random.split(key, 10)
    return {
        "conv1_w": _uniform(keys[0], (6, 3, 5, 5), 3 * 5 * 5),
        "conv1_b": _uniform(keys[1], (6,), 3 * 5 * 5),
        "conv2_w": _uniform(keys[2], (16, 6, 5, 5), 6 * 5 * 5),
        "conv2_b": _uniform(keys[3], (16,), 6 * 5 * 5),
        "fc1_w": _uniform(keys[4], (76, 16 * 5 * 5), 16 * 5 * 5),
        "fc1_b": _uniform(keys[5], (76,), 16 * 5 * 5),
        "fc2_w": _uniform(keys[6], (48, 76), 76),
        "fc2_b": _uniform(keys[7], (48,), 76),
        "fc3_w": _uniform(keys[8], (10, 48), 48),
        "fc3_b": _uniform(keys[9], (10,), 48),
    }


def prepare_params(params):
    """One-time weight padding / reshaping / bf16 casting (outside the forward)."""
    def pad2(a, rows, cols):
        return jnp.pad(a, ((0, rows - a.shape[0]), (0, cols - a.shape[1])))

    # conv1: (6,3,5,5) -> (8, 80) bf16; output channels padded 6 -> 8 (zero rows).
    c1p = 8
    k1 = 3 * 25
    w1 = pad2(params["conv1_w"].reshape(6, k1), c1p, _round_up(k1, 16))
    b1 = jnp.pad(params["conv1_b"], (0, c1p - 6)).reshape(c1p, 1)

    # conv2: Cin padded 6 -> 8 so it directly consumes conv1's padded
    # channel-major output (the extra channels are exactly zero).
    c2p = 16
    w2 = jnp.pad(params["conv2_w"], ((0, 0), (0, c1p - 6), (0, 0), (0, 0)))
    k2 = c1p * 25
    w2 = pad2(w2.reshape(16, k2), c2p, _round_up(k2, 16))
    b2 = params["conv2_b"].reshape(c2p, 1)

    # fc chain: keep PyTorch (out_features, in_features) orientation (no .T needed
    # because the FC kernel is transposed: lanes = batch).
    f1 = pad2(params["fc1_w"], 80, 400)
    g1 = jnp.pad(params["fc1_b"], (0, 4)).reshape(80, 1)
    f2 = pad2(params["fc2_w"], 48, 80)
    g2 = params["fc2_b"].reshape(48, 1)
    f3 = pad2(params["fc3_w"], 16, 48)
    g3 = jnp.pad(params["fc3_b"], (0, 6)).reshape(16, 1)

    bf, f32 = jnp.bfloat16, jnp.float32
    return {
        "conv1_w": w1.astype(bf), "conv1_b": b1.astype(f32),
        "conv2_w": w2.astype(bf), "conv2_b": b2.astype(f32),
        "fc1_w": f1.astype(bf), "fc1_b": g1.astype(f32),
        "fc2_w": f2.astype(bf), "fc2_b": g2.astype(f32),
        "fc3_w": f3.astype(bf), "fc3_b": g3.astype(f32),
    }


def cnn_forward(pp, x):
    """x: (B, 3, 32, 32) NCHW f32 -> (B, 10) f32 logits."""
    B = x.shape[0]
    # bf16 cast BEFORE the transpose (halves bytes moved by the host shuffle).
    x_cm = jnp.transpose(x.astype(jnp.bfloat16), (1, 0, 2, 3))     # (3, B, 32, 32)
    y1 = conv_relu_pool(x_cm, pp["conv1_w"], pp["conv1_b"],
                        m_order="bhw")                              # (8, B, 14, 14)
    y2 = conv_relu_pool(y1, pp["conv2_w"], pp["conv2_b"],
                        m_order="hwb")                              # (16, 25, B)
    # torch.flatten(x, 1) ordering (c, h, w); batch-innermost M makes this a
    # contiguous reshape (no transpose before the FC chain).
    x_fc = y2.reshape(16 * 5 * 5, B)                                # (400, B)
    return fc_chain(x_fc, pp)


def _ref_forward(params, x):
    """Pure-JAX f32 reference (PyTorch semantics) for a correctness check."""
    def conv(x, w, b):
        y = jax.lax.conv_general_dilated(
            x, w, window_strides=(1, 1), padding="VALID",
            dimension_numbers=("NCHW", "OIHW", "NCHW"))
        return jax.nn.relu(y + b[None, :, None, None])

    def pool(x):
        b, c, h, w = x.shape
        return x.reshape(b, c, h // 2, 2, w // 2, 2).max(axis=(3, 5))

    x = pool(conv(x, params["conv1_w"], params["conv1_b"]))
    x = pool(conv(x, params["conv2_w"], params["conv2_b"]))
    x = x.reshape(x.shape[0], -1)
    x = jax.nn.relu(x @ params["fc1_w"].T + params["fc1_b"])
    x = jax.nn.relu(x @ params["fc2_w"].T + params["fc2_b"])
    return x @ params["fc3_w"].T + params["fc3_b"]


# TODO(synk): QuantStub/DeQuantStub (quantize=True path) and sc_quantize /
# sc_circuit / float32_to_radix_arr are not part of the float forward pass and
# are not implemented here.


if __name__ == "__main__":
    key = jax.random.PRNGKey(0)
    k_params, k_input = jax.random.split(key)
    params = init_params(k_params)
    prepared = prepare_params(params)

    # CIFAR-shaped input implied by conv1(3, 6, 5) and fc1(16*5*5, 76): 3x32x32.
    x = jax.random.normal(k_input, (2, 3, 32, 32), dtype=jnp.float32)

    fwd = jax.jit(cnn_forward)
    out = jax.block_until_ready(fwd(prepared, x))
    assert out.shape == (2, 10), out.shape
    assert bool(jnp.all(jnp.isfinite(out)))

    # Loose tolerance: Pallas path uses bf16 operands with f32 accumulation.
    ref = _ref_forward(params, x)
    assert bool(jnp.allclose(out, ref, atol=1e-1, rtol=1e-1)), (
        float(jnp.max(jnp.abs(out - ref))))
    print("KERNEL_OK")
</pallas_src>

<mosaic_0001>
module attributes {stable_mosaic.version = 11 : i64} {
  func.func @_conv_relu_pool_kernel(%arg0: i32, %arg1: memref<8x80xbf16, #tpu.memory_space<vmem>>, %arg2: memref<8x1xf32, #tpu.memory_space<vmem>>, %arg3: memref<80x1024xbf16, #tpu.memory_space<vmem>>, %arg4: memref<8x256xbf16, #tpu.memory_space<vmem>>) attributes {dimension_semantics = [#tpu.dimension_semantics<parallel>], iteration_bounds = array<i64: 2>, scalar_prefetch = 0 : i64, scratch_operands = 0 : i64, tpu.core_type = #tpu.core_type<tc>, window_params = [{pipeline_mode = #tpu.pipeline_mode<synchronous>, transform_indices = @transform_0, window_bounds = array<i64: 8, 80>}, {pipeline_mode = #tpu.pipeline_mode<synchronous>, transform_indices = @transform_1, window_bounds = array<i64: 8, 1>}, {transform_indices = @transform_2, window_bounds = array<i64: 80, 1024>}, {transform_indices = @transform_3, window_bounds = array<i64: 8, 256>}]} {
    %c0 = arith.constant 0 : index
    %c0_0 = arith.constant 0 : index
    %0 = vector.load %arg1[%c0, %c0_0] : memref<8x80xbf16, #tpu.memory_space<vmem>>, vector<8x80xbf16>
    %c0_1 = arith.constant 0 : index
    %c0_2 = arith.constant 0 : index
    %1 = vector.load %arg3[%c0_1, %c0_2] : memref<80x1024xbf16, #tpu.memory_space<vmem>>, vector<80x1024xbf16>
    %cst = arith.constant dense<0.000000e+00> : vector<8x1024xf32>
    %2 = tpu.matmul %0, %1, %cst {dimension_numbers = #tpu.dot_dimension_numbers<[1], [0], [0], [1], [0, 0, 1, 1], [], []>} : vector<8x80xbf16>, vector<80x1024xbf16>, vector<8x1024xf32> -> vector<8x1024xf32>
    %3 = vector.extract_strided_slice %2 {offsets = [0, 0], sizes = [8, 256], strides = [1, 1]} : vector<8x1024xf32> to vector<8x256xf32>
    %4 = vector.extract_strided_slice %2 {offsets = [0, 256], sizes = [8, 256], strides = [1, 1]} : vector<8x1024xf32> to vector<8x256xf32>
    %5 = arith.maximumf %3, %4 : vector<8x256xf32>
    %6 = vector.extract_strided_slice %2 {offsets = [0, 512], sizes = [8, 256], strides = [1, 1]} : vector<8x1024xf32> to vector<8x256xf32>
    %7 = vector.extract_strided_slice %2 {offsets = [0, 768], sizes = [8, 256], strides = [1, 1]} : vector<8x1024xf32> to vector<8x256xf32>
    %8 = arith.maximumf %6, %7 : vector<8x256xf32>
    %9 = arith.maximumf %5, %8 : vector<8x256xf32>
    %c0_3 = arith.constant 0 : index
    %c0_4 = arith.constant 0 : index
    %10 = vector.load %arg2[%c0_3, %c0_4] : memref<8x1xf32, #tpu.memory_space<vmem>>, vector<8x1xf32>
    %11 = vector.broadcast %10 : vector<8x1xf32> to vector<8x256xf32>
    %12 = arith.addf %9, %11 : vector<8x256xf32>
    %cst_5 = arith.constant 0.000000e+00 : f32
    %13 = vector.broadcast %cst_5 : f32 to vector<8x256xf32>
    %14 = arith.maximumf %12, %13 : vector<8x256xf32>
    %15 = arith.truncf %14 : vector<8x256xf32> to vector<8x256xbf16>
    %c0_6 = arith.constant 0 : index
    %c0_7 = arith.constant 0 : index
    %16 = vector.load %arg4[%c0_6, %c0_7] : memref<8x256xbf16, #tpu.memory_space<vmem>>, vector<8x256xbf16>
    tpu.vector_store %arg4[%c0_6, %c0_7], %15 {strides = array<i32>} : memref<8x256xbf16, #tpu.memory_space<vmem>>, vector<8x256xbf16>,
    return
  }
  func.func @transform_0(%arg0: i32) -> (i32, i32) {
    %c0_i32 = arith.constant 0 : i32
    %c0_i32_0 = arith.constant 0 : i32
    %c0_i32_1 = arith.constant 0 : i32
    return %c0_i32, %c0_i32_0 : i32, i32
  }
  func.func @transform_1(%arg0: i32) -> (i32, i32) {
    %c0_i32 = arith.constant 0 : i32
    %c0_i32_0 = arith.constant 0 : i32
    %c0_i32_1 = arith.constant 0 : i32
    return %c0_i32, %c0_i32_0 : i32, i32
  }
  func.func @transform_2(%arg0: i32) -> (i32, i32) {
    %c0_i32 = arith.constant 0 : i32
    %c0_i32_0 = arith.constant 0 : i32
    return %c0_i32, %arg0 : i32, i32
  }
  func.func @transform_3(%arg0: i32) -> (i32, i32) {
    %c0_i32 = arith.constant 0 : i32
    %c0_i32_0 = arith.constant 0 : i32
    return %c0_i32, %arg0 : i32, i32
  }
}

module attributes {stable_mosaic.version = 11 : i64} {
  func.func @_conv_relu_pool_kernel(%arg0: i32, %arg1: memref<16x208xbf16, #tpu.memory_space<vmem>>, %arg2: memref<16x1xf32, #tpu.memory_space<vmem>>, %arg3: memref<208x512xbf16, #tpu.memory_space<vmem>>, %arg4: memref<16x128xbf16, #tpu.memory_space<vmem>>) attributes {dimension_semantics = [#tpu.dimension_semantics<parallel>], iteration_bounds = array<i64: 1>, scalar_prefetch = 0 : i64, scratch_operands = 0 : i64, tpu.core_type = #tpu.core_type<tc>, window_params = [{pipeline_mode = #tpu.pipeline_mode<synchronous>, transform_indices = @transform_0, window_bounds = array<i64: 16, 208>}, {pipeline_mode = #tpu.pipeline_mode<synchronous>, transform_indices = @transform_1, window_bounds = array<i64: 16, 1>}, {transform_indices = @transform_2, window_bounds = array<i64: 208, 512>}, {transform_indices = @transform_3, window_bounds = array<i64: 16, 128>}]} {
    %c0 = arith.constant 0 : index
    %c0_0 = arith.constant 0 : index
    %0 = vector.load %arg1[%c0, %c0_0] : memref<16x208xbf16, #tpu.memory_space<vmem>>, vector<16x208xbf16>
    %c0_1 = arith.constant 0 : index
    %c0_2 = arith.constant 0 : index
    %1 = vector.load %arg3[%c0_1, %c0_2] : memref<208x512xbf16, #tpu.memory_space<vmem>>, vector<208x512xbf16>
    %cst = arith.constant dense<0.000000e+00> : vector<16x512xf32>
    %2 = tpu.matmul %0, %1, %cst {dimension_numbers = #tpu.dot_dimension_numbers<[1], [0], [0], [1], [0, 0, 1, 1], [], []>} : vector<16x208xbf16>, vector<208x512xbf16>, vector<16x512xf32> -> vector<16x512xf32>
    %3 = vector.extract_strided_slice %2 {offsets = [0, 0], sizes = [16, 128], strides = [1, 1]} : vector<16x512xf32> to vector<16x128xf32>
    %4 = vector.extract_strided_slice %2 {offsets = [0, 128], sizes = [16, 128], strides = [1, 1]} : vector<16x512xf32> to vector<16x128xf32>
    %5 = arith.maximumf %3, %4 : vector<16x128xf32>
    %6 = vector.extract_strided_slice %2 {offsets = [0, 256], sizes = [16, 128], strides = [1, 1]} : vector<16x512xf32> to vector<16x128xf32>
    %7 = vector.extract_strided_slice %2 {offsets = [0, 384], sizes = [16, 128], strides = [1, 1]} : vector<16x512xf32> to vector<16x128xf32>
    %8 = arith.maximumf %6, %7 : vector<16x128xf32>
    %9 = arith.maximumf %5, %8 : vector<16x128xf32>
    %c0_3 = arith.constant 0 : index
    %c0_4 = arith.constant 0 : index
    %10 = vector.load %arg2[%c0_3, %c0_4] : memref<16x1xf32, #tpu.memory_space<vmem>>, vector<16x1xf32>
    %11 = vector.broadcast %10 : vector<16x1xf32> to vector<16x128xf32>
    %12 = arith.addf %9, %11 : vector<16x128xf32>
    %cst_5 = arith.constant 0.000000e+00 : f32
    %13 = vector.broadcast %cst_5 : f32 to vector<16x128xf32>
    %14 = arith.maximumf %12, %13 : vector<16x128xf32>
    %15 = arith.truncf %14 : vector<16x128xf32> to vector<16x128xbf16>
    %c0_6 = arith.constant 0 : index
    %c0_7 = arith.constant 0 : index
    %16 = vector.load %arg4[%c0_6, %c0_7] : memref<16x128xbf16, #tpu.memory_space<vmem>>, vector<16x128xbf16>
    tpu.vector_store %arg4[%c0_6, %c0_7], %15 {strides = array<i32>} : memref<16x128xbf16, #tpu.memory_space<vmem>>, vector<16x128xbf16>,
    return
  }
  func.func @transform_0(%arg0: i32) -> (i32, i32) {
    %c0_i32 = arith.constant 0 : i32
    %c0_i32_0 = arith.constant 0 : i32
    %c0_i32_1 = arith.constant 0 : i32
    return %c0_i32, %c0_i32_0 : i32, i32
  }
  func.func @transform_1(%arg0: i32) -> (i32, i32) {
    %c0_i32 = arith.constant 0 : i32
    %c0_i32_0 = arith.constant 0 : i32
    %c0_i32_1 = arith.constant 0 : i32
    return %c0_i32, %c0_i32_0 : i32, i32
  }
  func.func @transform_2(%arg0: i32) -> (i32, i32) {
    %c0_i32 = arith.constant 0 : i32
    %c0_i32_0 = arith.constant 0 : i32
    return %c0_i32, %arg0 : i32, i32
  }
  func.func @transform_3(%arg0: i32) -> (i32, i32) {
    %c0_i32 = arith.constant 0 : i32
    %c0_i32_0 = arith.constant 0 : i32
    return %c0_i32, %arg0 : i32, i32
  }
}

module attributes {stable_mosaic.version = 11 : i64} {
  func.func @_fc_chain_kernel(%arg0: i32, %arg1: memref<400x128xbf16, #tpu.memory_space<vmem>>, %arg2: memref<80x400xbf16, #tpu.memory_space<vmem>>, %arg3: memref<80x1xf32, #tpu.memory_space<vmem>>, %arg4: memref<48x80xbf16, #tpu.memory_space<vmem>>, %arg5: memref<48x1xf32, #tpu.memory_space<vmem>>, %arg6: memref<16x48xbf16, #tpu.memory_space<vmem>>, %arg7: memref<16x1xf32, #tpu.memory_space<vmem>>, %arg8: memref<16x128xf32, #tpu.memory_space<vmem>>) attributes {dimension_semantics = [#tpu.dimension_semantics<parallel>], iteration_bounds = array<i64: 1>, scalar_prefetch = 0 : i64, scratch_operands = 0 : i64, tpu.core_type = #tpu.core_type<tc>, window_params = [{transform_indices = @transform_0, window_bounds = array<i64: 400, 128>}, {pipeline_mode = #tpu.pipeline_mode<synchronous>, transform_indices = @transform_1, window_bounds = array<i64: 80, 400>}, {pipeline_mode = #tpu.pipeline_mode<synchronous>, transform_indices = @transform_2, window_bounds = array<i64: 80, 1>}, {pipeline_mode = #tpu.pipeline_mode<synchronous>, transform_indices = @transform_3, window_bounds = array<i64: 48, 80>}, {pipeline_mode = #tpu.pipeline_mode<synchronous>, transform_indices = @transform_4, window_bounds = array<i64: 48, 1>}, {pipeline_mode = #tpu.pipeline_mode<synchronous>, transform_indices = @transform_5, window_bounds = array<i64: 16, 48>}, {pipeline_mode = #tpu.pipeline_mode<synchronous>, transform_indices = @transform_6, window_bounds = array<i64: 16, 1>}, {transform_indices = @transform_7, window_bounds = array<i64: 16, 128>}]} {
    %c0 = arith.constant 0 : index
    %c0_0 = arith.constant 0 : index
    %0 = vector.load %arg2[%c0, %c0_0] : memref<80x400xbf16, #tpu.memory_space<vmem>>, vector<80x400xbf16>
    %c0_1 = arith.constant 0 : index
    %c0_2 = arith.constant 0 : index
    %1 = vector.load %arg1[%c0_1, %c0_2] : memref<400x128xbf16, #tpu.memory_space<vmem>>, vector<400x128xbf16>
    %cst = arith.constant dense<0.000000e+00> : vector<80x128xf32>
    %2 = tpu.matmul %0, %1, %cst {dimension_numbers = #tpu.dot_dimension_numbers<[1], [0], [0], [1], [0, 0, 1, 1], [], []>} : vector<80x400xbf16>, vector<400x128xbf16>, vector<80x128xf32> -> vector<80x128xf32>
    %c0_3 = arith.constant 0 : index
    %c0_4 = arith.constant 0 : index
    %3 = vector.load %arg3[%c0_3, %c0_4] : memref<80x1xf32, #tpu.memory_space<vmem>>, vector<80x1xf32>
    %4 = vector.broadcast %3 : vector<80x1xf32> to vector<80x128xf32>
    %5 = arith.addf %2, %4 : vector<80x128xf32>
    %cst_5 = arith.constant 0.000000e+00 : f32
    %6 = vector.broadcast %cst_5 : f32 to vector<80x128xf32>
    %7 = arith.maximumf %5, %6 : vector<80x128xf32>
    %8 = arith.truncf %7 : vector<80x128xf32> to vector<80x128xbf16>
    %c0_6 = arith.constant 0 : index
    %c0_7 = arith.constant 0 : index
    %9 = vector.load %arg4[%c0_6, %c0_7] : memref<48x80xbf16, #tpu.memory_space<vmem>>, vector<48x80xbf16>
    %cst_8 = arith.constant dense<0.000000e+00> : vector<48x128xf32>
    %10 = tpu.matmul %9, %8, %cst_8 {dimension_numbers = #tpu.dot_dimension_numbers<[1], [0], [0], [1], [0, 0, 1, 1], [], []>} : vector<48x80xbf16>, vector<80x128xbf16>, vector<48x128xf32> -> vector<48x128xf32>
    %c0_9 = arith.constant 0 : index
    %c0_10 = arith.constant 0 : index
    %11 = vector.load %arg5[%c0_9, %c0_10] : memref<48x1xf32, #tpu.memory_space<vmem>>, vector<48x1xf32>
    %12 = vector.broadcast %11 : vector<48x1xf32> to vector<48x128xf32>
    %13 = arith.addf %10, %12 : vector<48x128xf32>
    %cst_11 = arith.constant 0.000000e+00 : f32
    %14 = vector.broadcast %cst_11 : f32 to vector<48x128xf32>
    %15 = arith.maximumf %13, %14 : vector<48x128xf32>
    %16 = arith.truncf %15 : vector<48x128xf32> to vector<48x128xbf16>
    %c0_12 = arith.constant 0 : index
    %c0_13 = arith.constant 0 : index
    %17 = vector.load %arg6[%c0_12, %c0_13] : memref<16x48xbf16, #tpu.memory_space<vmem>>, vector<16x48xbf16>
    %cst_14 = arith.constant dense<0.000000e+00> : vector<16x128xf32>
    %18 = tpu.matmul %17, %16, %cst_14 {dimension_numbers = #tpu.dot_dimension_numbers<[1], [0], [0], [1], [0, 0, 1, 1], [], []>} : vector<16x48xbf16>, vector<48x128xbf16>, vector<16x128xf32> -> vector<16x128xf32>
    %c0_15 = arith.constant 0 : index
    %c0_16 = arith.constant 0 : index
    %19 = vector.load %arg7[%c0_15, %c0_16] : memref<16x1xf32, #tpu.memory_space<vmem>>, vector<16x1xf32>
    %20 = vector.broadcast %19 : vector<16x1xf32> to vector<16x128xf32>
    %21 = arith.addf %18, %20 : vector<16x128xf32>
    %c0_17 = arith.constant 0 : index
    %c0_18 = arith.constant 0 : index
    %22 = vector.load %arg8[%c0_17, %c0_18] : memref<16x128xf32, #tpu.memory_space<vmem>>, vector<16x128xf32>
    tpu.vector_store %arg8[%c0_17, %c0_18], %21 {strides = array<i32>} : memref<16x128xf32, #tpu.memory_space<vmem>>, vector<16x128xf32>,
    return
  }
  func.func @transform_0(%arg0: i32) -> (i32, i32) {
    %c0_i32 = arith.constant 0 : i32
    %c0_i32_0 = arith.constant 0 : i32
    return %c0_i32, %arg0 : i32, i32
  }
  func.func @transform_1(%arg0: i32) -> (i32, i32) {
    %c0_i32 = arith.constant 0 : i32
    %c0_i32_0 = arith.constant 0 : i32
    %c0_i32_1 = arith.constant 0 : i32
    return %c0_i32, %c0_i32_0 : i32, i32
  }
  func.func @transform_2(%arg0: i32) -> (i32, i32) {
    %c0_i32 = arith.constant 0 : i32
    %c0_i32_0 = arith.constant 0 : i32
    %c0_i32_1 = arith.constant 0 : i32
    return %c0_i32, %c0_i32_0 : i32, i32
  }
  func.func @transform_3(%arg0: i32) -> (i32, i32) {
    %c0_i32 = arith.constant 0 : i32
    %c0_i32_0 = arith.constant 0 : i32
    %c0_i32_1 = arith.constant 0 : i32
    return %c0_i32, %c0_i32_0 : i32, i32
  }
  func.func @transform_4(%arg0: i32) -> (i32, i32) {
    %c0_i32 = arith.constant 0 : i32
    %c0_i32_0 = arith.constant 0 : i32
    %c0_i32_1 = arith.constant 0 : i32
    return %c0_i32, %c0_i32_0 : i32, i32
  }
  func.func @transform_5(%arg0: i32) -> (i32, i32) {
    %c0_i32 = arith.constant 0 : i32
    %c0_i32_0 = arith.constant 0 : i32
    %c0_i32_1 = arith.constant 0 : i32
    return %c0_i32, %c0_i32_0 : i32, i32
  }
  func.func @transform_6(%arg0: i32) -> (i32, i32) {
    %c0_i32 = arith.constant 0 : i32
    %c0_i32_0 = arith.constant 0 : i32
    %c0_i32_1 = arith.constant 0 : i32
    return %c0_i32, %c0_i32_0 : i32, i32
  }
  func.func @transform_7(%arg0: i32) -> (i32, i32) {
    %c0_i32 = arith.constant 0 : i32
    %c0_i32_0 = arith.constant 0 : i32
    return %c0_i32, %arg0 : i32, i32
  }
}

</mosaic_0001>

<bundles_post_ra>
// kernel: cnn_forward.3
= control target key start
LH: loop header
LB: loop body
LE: loop exit
PB: predicated region body
PF: predicated region fallthrough
CT: control target
= control target key end

     0   :  { %s899_s12 = smov 0   ;;  %s901_s13 = smov 0   ;;  %s1092_s0 = inlined_call_operand.vmem [shape: bf16[8,80], index: 0, kind: input, shape index: {}]   ;;  %s1093_s1 = inlined_call_operand.vmem [shape: f32[8,1], index: 1, kind: input, shape index: {}]   ;;  %s1094_s2 = inlined_call_operand.vmem [shape: bf16[80,2048], index: 2, kind: input, shape index: {}]   ;;  %s1095_s3 = inlined_call_operand.vmem [shape: bf16[8,512], index: 3, kind: output, shape index: {}]  }
   0x1   :  { %s903_s14 = smov 0  }
   0x2 LB: > { %s768_s15 = sadd.s32 4294967295, %s876_s14   ;;  %s916_s16 = sadd.s32 1, %s876_s14   ;;  %s876_s14 = sphi %s903_s14, %s1098_s14   ;;  %s872_s13 = sphi %s901_s13, %s1097_s13   ;;  %s868_s12 = sphi %s899_s12, %s1096_s12  }
   0x3   : > { %s59_s17 = ssub.s32 %s876_s14, %s916_s16  ;;  %s62_s18 = sadd.s32 1, %s872_s13 }
   0x4   : > { %p60_p0 = scmp.eq.s32.totalorder %s59_s17, 0  ;;  %p69_p1 = scmp.ne.s32.totalorder %s872_s13, %s868_s12 }
   0x5   : > { %p70_p2 = scmp.eq.s32.totalorder %s876_s14, 0  ;;  %p771_p4 = scmp.ge.s32.totalorder %s876_s14, 2 }
   0x6   : > { %s925_s19 = scalar_select %p60_p0, %s872_s13, %s62_s18  }
   0x7   : > { %p71_p3 = por %p70_p2, %p69_p1  ;;  %127 = sbr.rel (%p771_p4) target bundleno = 37 (0x25), region = 24 }
   0xc   : > { %130 = sbr.rel (!%p71_p3) target bundleno = 37 (0x25), region = 28  ;;  %s132_s20 = sand.u32 (%p71_p3), 1, %s872_s13  }
   0xd   : > { %s824_s21 = sshll.u32 (%p71_p3), %s876_s14, 5  ;;  %s826_s22 = smul.u32 (%p71_p3), 320, %s132_s20 }
   0xe   : > { %s933_s25 = scalar_lea.vmem (%p71_p3), %s1094_s2, %s824_s21 }
   0xf   : > { %v150_v0 = vld [vmem:[%s933_s25] sm:$0xff] (%p71_p3)  ;;  %v152_v1 = vld [vmem:[%s933_s25 + $0x8] sm:$0xff] (%p71_p3)  ;;  %v154_v2 = vld [vmem:[%s933_s25 + $0x10] sm:$0xff] (%p71_p3)  ;;  %s941_s26 = scalar_lea.vmem (%p71_p3), [#allocation2], %s826_s22 }
  0x10   : > { %v156_v3 = vld [vmem:[%s933_s25 + $0x18] sm:$0xff] (%p71_p3)  ;;  %v158_v4 = vld [vmem:[%s933_s25 + $0x40] sm:$0xff] (%p71_p3)  ;;  %v160_v5 = vld [vmem:[%s933_s25 + $0x48] sm:$0xff] (%p71_p3)  ;;  %151 = vst [vmem:[%s941_s26] sm:$0xff] (%p71_p3), %v150_v0 }
  0x11   : > { %153 = vst [vmem:[%s941_s26 + $0x8] sm:$0xff] %v152_v1  ;;  %155 = vst [vmem:[%s941_s26 + $0x10] sm:$0xff] %v154_v2  ;;  %v162_v6 = vld [vmem:[%s933_s25 + $0x50] sm:$0xff]  ;;  %v164_v7 = vld [vmem:[%s933_s25 + $0x58] sm:$0xff] }
  0x12   : > { %157 = vst [vmem:[%s941_s26 + $0x18] sm:$0xff] %v156_v3  ;;  %159 = vst [vmem:[%s941_s26 + $0x20] sm:$0xff] %v158_v4  ;;  %v166_v8 = vld [vmem:[%s933_s25 + $0x80] sm:$0xff]  ;;  %v168_v9 = vld [vmem:[%s933_s25 + $0x88] sm:$0xff] }
  0x13   : > { %161 = vst [vmem:[%s941_s26 + $0x28] sm:$0xff] %v160_v5  ;;  %163 = vst [vmem:[%s941_s26 + $0x30] sm:$0xff] %v162_v6  ;;  %v170_v10 = vld [vmem:[%s933_s25 + $0x90] sm:$0xff]  ;;  %v172_v11 = vld [vmem:[%s933_s25 + $0x98] sm:$0xff] }
  0x14   : > { %165 = vst [vmem:[%s941_s26 + $0x38] sm:$0xff] %v164_v7  ;;  %167 = vst [vmem:[%s941_s26 + $0x40] sm:$0xff] %v166_v8  ;;  %v174_v12 = vld [vmem:[%s933_s25 + $0xc0] sm:$0xff]  ;;  %v176_v13 = vld [vmem:[%s933_s25 + $0xc8] sm:$0xff] }
  0x15   : > { %169 = vst [vmem:[%s941_s26 + $0x48] sm:$0xff] %v168_v9  ;;  %171 = vst [vmem:[%s941_s26 + $0x50] sm:$0xff] %v170_v10  ;;  %v178_v14 = vld [vmem:[%s933_s25 + $0xd0] sm:$0xff]  ;;  %v180_v15 = vld [vmem:[%s933_s25 + $0xd8] sm:$0xff] }
  0x16   : > { %173 = vst [vmem:[%s941_s26 + $0x58] sm:$0xff] %v172_v11  ;;  %175 = vst [vmem:[%s941_s26 + $0x60] sm:$0xff] %v174_v12  ;;  %v182_v16 = vld [vmem:[%s933_s25 + $0x100] sm:$0xff]  ;;  %v184_v17 = vld [vmem:[%s933_s25 + $0x108] sm:$0xff] }
  0x17   : > { %177 = vst [vmem:[%s941_s26 + $0x68] sm:$0xff] %v176_v13  ;;  %179 = vst [vmem:[%s941_s26 + $0x70] sm:$0xff] %v178_v14  ;;  %v186_v18 = vld [vmem:[%s933_s25 + $0x110] sm:$0xff]  ;;  %v188_v19 = vld [vmem:[%s933_s25 + $0x118] sm:$0xff] }
  0x18   : > { %181 = vst [vmem:[%s941_s26 + $0x78] sm:$0xff] %v180_v15  ;;  %183 = vst [vmem:[%s941_s26 + $0x80] sm:$0xff] %v182_v16  ;;  %v190_v20 = vld [vmem:[%s933_s25 + $0x140] sm:$0xff]  ;;  %v192_v21 = vld [vmem:[%s933_s25 + $0x148] sm:$0xff] }
  0x19   : > { %185 = vst [vmem:[%s941_s26 + $0x88] sm:$0xff] %v184_v17  ;;  %187 = vst [vmem:[%s941_s26 + $0x90] sm:$0xff] %v186_v18  ;;  %v194_v22 = vld [vmem:[%s933_s25 + $0x150] sm:$0xff]  ;;  %v196_v23 = vld [vmem:[%s933_s25 + $0x158] sm:$0xff] }
  0x1a   : > { %189 = vst [vmem:[%s941_s26 + $0x98] sm:$0xff] %v188_v19  ;;  %191 = vst [vmem:[%s941_s26 + $0xa0] sm:$0xff] %v190_v20  ;;  %v198_v24 = vld [vmem:[%s933_s25 + $0x180] sm:$0xff]  ;;  %v200_v25 = vld [vmem:[%s933_s25 + $0x188] sm:$0xff] }
  0x1b   : > { %193 = vst [vmem:[%s941_s26 + $0xa8] sm:$0xff] %v192_v21  ;;  %195 = vst [vmem:[%s941_s26 + $0xb0] sm:$0xff] %v194_v22  ;;  %v202_v26 = vld [vmem:[%s933_s25 + $0x190] sm:$0xff]  ;;  %v204_v27 = vld [vmem:[%s933_s25 + $0x198] sm:$0xff] }
  0x1c   : > { %197 = vst [vmem:[%s941_s26 + $0xb8] sm:$0xff] %v196_v23  ;;  %199 = vst [vmem:[%s941_s26 + $0xc0] sm:$0xff] %v198_v24  ;;  %v206_v28 = vld [vmem:[%s933_s25 + $0x1c0] sm:$0xff]  ;;  %v208_v29 = vld [vmem:[%s933_s25 + $0x1c8] sm:$0xff] }
  0x1d   : > { %201 = vst [vmem:[%s941_s26 + $0xc8] sm:$0xff] %v200_v25  ;;  %203 = vst [vmem:[%s941_s26 + $0xd0] sm:$0xff] %v202_v26  ;;  %v210_v30 = vld [vmem:[%s933_s25 + $0x1d0] sm:$0xff]  ;;  %v212_v31 = vld [vmem:[%s933_s25 + $0x1d8] sm:$0xff] }
  0x1e   : > { %205 = vst [vmem:[%s941_s26 + $0xd8] sm:$0xff] %v204_v27  ;;  %207 = vst [vmem:[%s941_s26 + $0xe0] sm:$0xff] %v206_v28  ;;  %v214_v32 = vld [vmem:[%s933_s25 + $0x200] sm:$0xff]  ;;  %v216_v33 = vld [vmem:[%s933_s25 + $0x208] sm:$0xff] }
  0x1f   : > { %209 = vst [vmem:[%s941_s26 + $0xe8] sm:$0xff] %v208_v29  ;;  %211 = vst [vmem:[%s941_s26 + $0xf0] sm:$0xff] %v210_v30  ;;  %v218_v34 = vld [vmem:[%s933_s25 + $0x210] sm:$0xff]  ;;  %v220_v35 = vld [vmem:[%s933_s25 + $0x218] sm:$0xff] }
  0x20   : > { %213 = vst [vmem:[%s941_s26 + $0xf8] sm:$0xff] %v212_v31  ;;  %215 = vst [vmem:[%s941_s26 + $0x100] sm:$0xff] %v214_v32  ;;  %v222_v36 = vld [vmem:[%s933_s25 + $0x240] sm:$0xff]  ;;  %v224_v37 = vld [vmem:[%s933_s25 + $0x248] sm:$0xff] }
  0x21   : > { %217 = vst [vmem:[%s941_s26 + $0x108] sm:$0xff] %v216_v33  ;;  %219 = vst [vmem:[%s941_s26 + $0x110] sm:$0xff] %v218_v34  ;;  %v226_v38 = vld [vmem:[%s933_s25 + $0x250] sm:$0xff]  ;;  %v228_v39 = vld [vmem:[%s933_s25 + $0x258] sm:$0xff] }
  0x22   : > { %221 = vst [vmem:[%s941_s26 + $0x118] sm:$0xff] %v220_v35  ;;  %223 = vst [vmem:[%s941_s26 + $0x120] sm:$0xff] %v222_v36 }
  0x23   : > { %225 = vst [vmem:[%s941_s26 + $0x128] sm:$0xff] %v224_v37  ;;  %227 = vst [vmem:[%s941_s26 + $0x130] sm:$0xff] %v226_v38 }
  0x24   : > { %229 = vst [vmem:[%s941_s26 + $0x138] sm:$0xff] %v228_v39 }
  0x25 PF: > { %p774_p5 = scmp.ge.s32.totalorder %s876_s14, 1  ;;  %p234_p6 = scmp.lt.s32.totalorder %s876_s14, 3 }
  0x27   : > { %p235_p7 = pnand %p774_p5, %p234_p6 }
  0x28   : > { %s241_s27 = sand.u32 (!%p235_p7), 1, %s868_s12   ;;  %s775_s7 = sshll.u32 (!%p235_p7), %s768_s15, 1 }
  0x29   : > { %238 = sbr.rel (%p235_p7) target bundleno = 297 (0x129), region = 51  ;;  %p266_p8 = scmp.lt.s32.totalorder (!%p235_p7), %s775_s7, 3 }
  0x2a   : > { %s827_s30 = smul.u32 (!%p235_p7), 320, %s241_s27 }
  0x2c   : > { %s1026_s4 = scalar_lea.vmem (!%p235_p7), [#allocation2], %s827_s30 }
  0x2e   : > { %v687_v40 = vld [vmem:[%s1093_s1] sm:$0xff]  ;;  %v878_v41 = vmov 0   ;;  %v306_v44 = vld [vmem:[%s1026_s4 + $0x108] sm:$0xff]  ;;  %v307_v16 = vld [vmem:[%s1026_s4 + $0x110] sm:$0xff]  ;;  %vm513_vm0 = vcmask 654336   ;;  %s1100_s7 = smov (!%p266_p8, %s775_s7), 3 }
  0x2f   : > { %549 = vmatprep.mubr.bf16.mxu0 %v878_v41  ;;  %590 = vmatprep.mubr.bf16.mxu1 %v878_v41  ;;  %v305_v42 = vld [vmem:[%s1026_s4 + $0x100] sm:$0xff]  ;;  %v310_v46 = vld [vmem:[%s1026_s4 + $0x128] sm:$0xff]  ;;  %v311_v17 = vld [vmem:[%s1026_s4 + $0x130] sm:$0xff]  ;;  %s776_s8 = sshll.u32 %s1100_s7, 2 }
  0x30   : > { %853 = vset.pattern.permute.xlu0 %v878_v41  ;;  %v309_v43 = vld [vmem:[%s1026_s4 + $0x120] sm:$0xff]  ;;  %v812_v50 = vcombine.high %v306_v44, %v310_v46  ;;  %v811_v51 = vcombine.low %v306_v44, %v310_v46  ;;  %v298_v53 = vld [vmem:[%s1026_s4 + $0xc8] sm:$0xff]  ;;  %v308_v18 = vld [vmem:[%s1026_s4 + $0x118] sm:$0xff]  ;;  %v814_v22 = vcombine.high %v307_v16, %v311_v17  ;;  %v813_v29 = vcombine.low %v307_v16, %v311_v17  ;;  %s269_s11 = scalar_lea.vmem %s1095_s3, %s776_s8 }
  0x31   : > { %690 = vperm.xlu0 %853, %v687_v40   ;;  %v810_v45 = vcombine.high %v305_v42, %v309_v43  ;;  %v809_v47 = vcombine.low %v305_v42, %v309_v43  ;;  %v297_v48 = vld [vmem:[%s1026_s4 + $0xc0] sm:$0xff]  ;;  %v302_v54 = vld [vmem:[%s1026_s4 + $0xe8] sm:$0xff]  ;;  %v312_v19 = vld [vmem:[%s1026_s4 + $0x138] sm:$0xff] }
  0x32   : > { %v301_v49 = vld [vmem:[%s1026_s4 + $0xe0] sm:$0xff]  ;;  %v804_v56 = vcombine.high %v298_v53, %v302_v54  ;;  %v290_v58 = vld [vmem:[%s1026_s4 + $0x88] sm:$0xff]  ;;  %564 = vmatprep.subr.bf16.mxu1 %v812_v50  ;;  %v803_v61 = vcombine.low %v298_v53, %v302_v54  ;;  %v816_v23 = vcombine.high %v308_v18, %v312_v19  ;;  %v299_v24 = vld [vmem:[%s1026_s4 + $0xd0] sm:$0xff]  ;;  %v815_v30 = vcombine.low %v308_v18, %v312_v19 }
  0x33   : > { %v802_v52 = vcombine.high %v297_v48, %v301_v49  ;;  %v289_v55 = vld [vmem:[%s1026_s4 + $0x80] sm:$0xff]  ;;  %523 = vmatprep.subr.bf16.mxu0 %v810_v45  ;;  %v294_v59 = vld [vmem:[%s1026_s4 + $0xa8] sm:$0xff]  ;;  %v801_v60 = vcombine.low %v297_v48, %v301_v49  ;;  %565 = vmatpush1.bf16.msra.mxu1 %v811_v51  ;;  %v303_v25 = vld [vmem:[%s1026_s4 + $0xf0] sm:$0xff] }
  0x34   : > { %v293_v57 = vld [vmem:[%s1026_s4 + $0xa0] sm:$0xff]  ;;  %524 = vmatpush1.bf16.msra.mxu0 %v809_v47  ;;  %566 = vmatprep.subr.bf16.mxu1 %v804_v56  ;;  %v796_v63 = vcombine.high %v290_v58, %v294_v59  ;;  %v282_v2 = vld [vmem:[%s1026_s4 + $0x48] sm:$0xff]  ;;  %v795_v5 = vcombine.low %v290_v58, %v294_v59  ;;  %v300_v26 = vld [vmem:[%s1026_s4 + $0xd8] sm:$0xff]  ;;  %v806_v31 = vcombine.high %v299_v24, %v303_v25 }
  0x35   : > { %525 = vmatprep.subr.bf16.mxu0 %v802_v52  ;;  %v794_v62 = vcombine.high %v289_v55, %v293_v57  ;;  %v281_v0 = vld [vmem:[%s1026_s4 + $0x40] sm:$0xff]  ;;  %v286_v3 = vld [vmem:[%s1026_s4 + $0x68] sm:$0xff]  ;;  %v793_v4 = vcombine.low %v289_v55, %v293_v57  ;;  %v304_v27 = vld [vmem:[%s1026_s4 + $0xf8] sm:$0xff]  ;;  %v805_v37 = vcombine.low %v299_v24, %v303_v25 }
  0x36   : > { %v285_v1 = vld [vmem:[%s1026_s4 + $0x60] sm:$0xff]  ;;  %v788_v7 = vcombine.high %v282_v2, %v286_v3  ;;  %v274_v10 = vld [vmem:[%s1026_s4 + $0x8] sm:$0xff]  ;;  %v787_v13 = vcombine.low %v282_v2, %v286_v3  ;;  %v808_v32 = vcombine.high %v300_v26, %v304_v27  ;;  %v291_v33 = vld [vmem:[%s1026_s4 + $0x90] sm:$0xff]  ;;  %v807_v38 = vcombine.low %v300_v26, %v304_v27 }
  0x37   : > { %567 = vmatpush1.bf16.msra.mxu1 %v803_v61  ;;  %v786_v6 = vcombine.high %v281_v0, %v285_v1  ;;  %v273_v8 = vld [vmem:[%s1026_s4] sm:$0xff]  ;;  %v278_v11 = vld [vmem:[%s1026_s4 + $0x28] sm:$0xff]  ;;  %v785_v12 = vcombine.low %v281_v0, %v285_v1  ;;  %v295_v34 = vld [vmem:[%s1026_s4 + $0xb0] sm:$0xff] }
  0x38   : > { %526 = vmatpush1.bf16.msra.mxu0 %v801_v60  ;;  %568 = vmatprep.subr.bf16.mxu1 %v796_v63  ;;  %v277_v9 = vld [vmem:[%s1026_s4 + $0x20] sm:$0xff]  ;;  %v780_v15 = vcombine.high %v274_v10, %v278_v11  ;;  %v779_v21 = vcombine.low %v274_v10, %v278_v11  ;;  %v292_v35 = vld [vmem:[%s1026_s4 + $0x98] sm:$0xff]  ;;  %v798_v39 = vcombine.high %v291_v33, %v295_v34  ;;  %v283_v42 = vld [vmem:[%s1026_s4 + $0x50] sm:$0xff] }
  0x39   : > { %527 = vmatprep.subr.bf16.mxu0 %v794_v62  ;;  %v778_v14 = vcombine.high %v273_v8, %v277_v9  ;;  %v777_v20 = vcombine.low %v273_v8, %v277_v9  ;;  %v272_v28 = vld [vmem:[%s1092_s0] sm:$0xf]  ;;  %v296_v36 = vld [vmem:[%s1026_s4 + $0xb8] sm:$0xff]  ;;  %v287_v43 = vld [vmem:[%s1026_s4 + $0x70] sm:$0xff]  ;;  %v797_v46 = vcombine.low %v291_v33, %v295_v34 }
  0x3a   : > { %v800_v40 = vcombine.high %v292_v35, %v296_v36  ;;  %v284_v44 = vld [vmem:[%s1026_s4 + $0x58] sm:$0xff]  ;;  %v799_v47 = vcombine.low %v292_v35, %v296_v36  ;;  %v790_v48 = vcombine.high %v283_v42, %v287_v43  ;;  %v275_v50 = vld [vmem:[%s1026_s4 + $0x10] sm:$0xff]  ;;  %v789_v54 = vcombine.low %v283_v42, %v287_v43 }
  0x3b   : > { %569 = vmatpush1.bf16.msra.mxu1 %v795_v5  ;;  %v288_v45 = vld [vmem:[%s1026_s4 + $0x78] sm:$0xff]  ;;  %v279_v51 = vld [vmem:[%s1026_s4 + $0x30] sm:$0xff] }
  0x3c   : > { %528 = vmatpush1.bf16.msra.mxu0 %v793_v4  ;;  %570 = vmatprep.subr.bf16.mxu1 %v788_v7  ;;  %v792_v49 = vcombine.high %v284_v44, %v288_v45  ;;  %v276_v52 = vld [vmem:[%s1026_s4 + $0x18] sm:$0xff]  ;;  %v791_v55 = vcombine.low %v284_v44, %v288_v45  ;;  %v782_v56 = vcombine.high %v275_v50, %v279_v51 }
  0x3d   : > { %529 = vmatprep.subr.bf16.mxu0 %v786_v6  ;;  %v280_v53 = vld [vmem:[%s1026_s4 + $0x38] sm:$0xff]  ;;  %v781_v57 = vcombine.low %v275_v50, %v279_v51 }
  0x3e   : > { %v783_v58 = vcombine.low %v276_v52, %v280_v53 }
  0x3f   : > { %571 = vmatpush1.bf16.msra.mxu1 %v787_v13 }
  0x40   : > { %530 = vmatpush1.bf16.msra.mxu0 %v785_v12  ;;  %572 = vmatprep.subr.bf16.mxu1 %v780_v15 }
  0x41   : > { %531 = vmatprep.subr.bf16.mxu0 %v778_v14 }
  0x43   : > { %573 = vmatpush1.bf16.msra.mxu1 %v779_v21 }
  0x44   : > { %532 = vmatpush1.bf16.msra.mxu0 %v777_v20  ;;  %646 = vmatprep.subr.bf16.mxu1 %v816_v23 }
  0x45   : > { %605 = vmatprep.subr.bf16.mxu0 %v814_v22 }
  0x46   : > { %818 = vmatmul.mubr.msk.bf16.vlgmr.msra.gmra.mxu1 %vm513_vm0, %v272_v28 }
  0x47   : > { %817 = vmatmul.mubr.msk.bf16.vlgmr.msra.gmra.mxu0 %vm513_vm0, %v272_v28  ;;  %647 = vmatpush1.bf16.msra.mxu1 %v815_v30 }
  0x48   : > { %606 = vmatpush1.bf16.msra.mxu0 %v813_v29  ;;  %648 = vmatprep.subr.bf16.mxu1 %v808_v32 }
  0x49   : > { %607 = vmatprep.subr.bf16.mxu0 %v806_v31  ;;  %631 = vmatprep.mubr.bf16.mxu0 %v878_v41 }
  0x4a   : > { %672 = vmatprep.mubr.bf16.mxu1 %v878_v41  ;;  %v784_v41 = vcombine.high %v276_v52, %v280_v53 }
  0x4b   : > { %649 = vmatpush1.bf16.msra.mxu1 %v807_v38 }
  0x4c   : > { %608 = vmatpush1.bf16.msra.mxu0 %v805_v37  ;;  %650 = vmatprep.subr.bf16.mxu1 %v800_v40 }
  0x4d   : > { %609 = vmatprep.subr.bf16.mxu0 %v798_v39 }
  0x4f   : > { %651 = vmatpush1.bf16.msra.mxu1 %v799_v47 }
  0x50   : > { %610 = vmatpush1.bf16.msra.mxu0 %v797_v46  ;;  %652 = vmatprep.subr.bf16.mxu1 %v792_v49 }
  0x51   : > { %611 = vmatprep.subr.bf16.mxu0 %v790_v48 }
  0x53   : > { %653 = vmatpush1.bf16.msra.mxu1 %v791_v55 }
  0x54   : > { %612 = vmatpush1.bf16.msra.mxu0 %v789_v54  ;;  %654 = vmatprep.subr.bf16.mxu1 %v784_v41 }
  0x55   : > { %613 = vmatprep.subr.bf16.mxu0 %v782_v56 }
  0x57   : > { %655 = vmatpush1.bf16.msra.mxu1 %v783_v58 }
  0x58   : > { %614 = vmatpush1.bf16.msra.mxu0 %v781_v57 }
  0x5a   : > { %820 = vmatmul.mubr.msk.bf16.vlgmr.msra.gmra.mxu1 %vm513_vm0, %v272_v28 }
  0x5b   : > { %819 = vmatmul.mubr.msk.bf16.vlgmr.msra.gmra.mxu0 %vm513_vm0, %v272_v28 }
  0xac   : > { %v691_v9 = vpop.permute.xlu0 %690 }
 0x106   : > { %v592_v60 = vpop.f32.mrf.mxu1 }
 0x107   : > { %v551_v59 = vpop.f32.mrf.mxu0 }
 0x108   : > { %v594_v62 = vpop.f32.mrf.mxu1  ;;  %v681_v5 = vmax.f32 %v551_v59, %v592_v60 }
 0x109   : > { %v553_v61 = vpop.f32.mrf.mxu0 }
 0x10a   : > { %v596_v0 = vpop.f32.mrf.mxu1  ;;  %v682_v10 = vmax.f32 %v553_v61, %v594_v62 }
 0x10b   : > { %v555_v63 = vpop.f32.mrf.mxu0 }
 0x10c   : > { %v597_v2 = vpop.f32.mrf.mxu1 }
 0x10d   : > { %v556_v1 = vpop.f32.mrf.mxu0 }
 0x11a   : > { %v674_v4 = vpop.f32.mrf.mxu1 }
 0x11b   : > { %v633_v3 = vpop.f32.mrf.mxu0 }
 0x11c   : > { %v683_v6 = vmax.f32 %v633_v3, %v674_v4  ;;  %v676_v8 = vpop.f32.mrf.mxu1 }
 0x11d   : > { %v635_v7 = vpop.f32.mrf.mxu0 }
 0x11e   : > { %v684_v11 = vmax.f32 %v635_v7, %v676_v8  ;;  %v685_v12 = vmax.f32 %v681_v5, %v683_v6  ;;  %v678_v14 = vpop.f32.mrf.mxu1 }
 0x11f   : > { %v637_v13 = vpop.f32.mrf.mxu0 }
 0x120   : > { %v686_v15 = vmax.f32 %v682_v10, %v684_v11  ;;  %v693_v16 = vadd.f32 %v691_v9, %v685_v12  ;;  %v679_v18 = vpop.f32.mrf.mxu1 }
 0x121   : > { %v638_v17 = vpop.f32.mrf.mxu0 }
 0x122   : > { %v694_v19 = vadd.f32 %v691_v9, %v686_v15  ;;  %v695_v20 = vmax.f32 %v693_v16, 0.0 }
 0x124   : > { %v696_v21 = vmax.f32 %v694_v19, 0.0 }
 0x126   : > { %v825_v22 = vpack.c.bf16 %v696_v21, %v695_v20 }
 0x128   : > { %705 = vst [vmem:[%s269_s11] sm:$0xff] %v825_v22 }
 0x129 PF: > { %p10_p9 = scmp.ge.s32.totalorder %s916_s16, 4   ;;  %s1096_s12 = smov %s872_s13 }
 0x12a   : > { %s1097_s13 = smov %s925_s19  ;;  %s1098_s14 = smov %s916_s16 }
 0x12b   :  { %12 = sbr.rel (!%p10_p9) target bundleno = 2 (0x2), region = 90 }

// kernel: cnn_forward.4
= control target key start
LH: loop header
LB: loop body
LE: loop exit
PB: predicated region body
PF: predicated region fallthrough
CT: control target
= control target key end

     0   :  { %v612_v1 = vmov 0   ;;  %vm338_vm0 = vcmask 654336   ;;  %s804_s2 = inlined_call_operand.vmem [shape: bf16[208,512], index: 2, kind: input, shape index: {}]   ;;  %s805_s0 = inlined_call_operand.vmem [shape: bf16[16,208], index: 0, kind: input, shape index: {}]   ;;  %s806_s1 = inlined_call_operand.vmem [shape: f32[16,1], index: 1, kind: input, shape index: {}]   ;;  %s807_s3 = inlined_call_operand.vmem [shape: bf16[16,128], index: 3, kind: output, shape index: {}]  }
   0x1   :  { %v531_v0 = vld [vmem:[%s804_s2 + $0xe4] ss:$16 sps:$4 sm:$0xff]   ;;  %530 = vset.pattern.permute.xlu0 %v612_v1  ;;  %v533_v2 = vld [vmem:[%s804_s2 + $0xec] ss:$16 sps:$4 sm:$0xff]   ;;  %v535_v3 = vld [vmem:[%s804_s2 + $0xe0] ss:$16 sps:$4 sm:$0xff]  }
   0x2   :  { %342 = vmatprep.subr.bf16.mxu0 %v531_v0  ;;  %v536_v4 = vld [vmem:[%s804_s2 + $0xe8] ss:$16 sps:$4 sm:$0xff]   ;;  %385 = vmatprep.subr.bf16.mxu1 %v533_v2  ;;  %v537_v5 = vld [vmem:[%s804_s2 + $0xc4] ss:$16 sps:$4 sm:$0xff]   ;;  %v539_v6 = vld [vmem:[%s804_s2 + $0xcc] ss:$16 sps:$4 sm:$0xff]  }
   0x3   :  { %343 = vmatpush1.bf16.msra.mxu0 %v535_v3  ;;  %386 = vmatpush1.bf16.msra.mxu1 %v536_v4  ;;  %v541_v7 = vld [vmem:[%s804_s2 + $0xc0] ss:$16 sps:$4 sm:$0xff]   ;;  %v542_v8 = vld [vmem:[%s804_s2 + $0xc8] ss:$16 sps:$4 sm:$0xff]   ;;  %v543_v9 = vld [vmem:[%s804_s2 + $0xa4] ss:$16 sps:$4 sm:$0xff]  }
   0x4   :  { %344 = vmatprep.subr.bf16.mxu0 %v537_v5  ;;  %387 = vmatprep.subr.bf16.mxu1 %v539_v6  ;;  %v545_v10 = vld [vmem:[%s804_s2 + $0xac] ss:$16 sps:$4 sm:$0xff]   ;;  %v547_v11 = vld [vmem:[%s804_s2 + $0xa0] ss:$16 sps:$4 sm:$0xff]   ;;  %v548_v12 = vld [vmem:[%s804_s2 + $0xa8] ss:$16 sps:$4 sm:$0xff]  }
   0x5   :  { %v549_v13 = vld [vmem:[%s804_s2 + $0x84] ss:$16 sps:$4 sm:$0xff]   ;;  %v551_v14 = vld [vmem:[%s804_s2 + $0x8c] ss:$16 sps:$4 sm:$0xff]   ;;  %v553_v15 = vld [vmem:[%s804_s2 + $0x80] ss:$16 sps:$4 sm:$0xff]  }
   0x6   :  { %v554_v16 = vld [vmem:[%s804_s2 + $0x88] ss:$16 sps:$4 sm:$0xff]   ;;  %v555_v17 = vld [vmem:[%s804_s2 + $0x64] ss:$16 sps:$4 sm:$0xff]   ;;  %v557_v18 = vld [vmem:[%s804_s2 + $0x6c] ss:$16 sps:$4 sm:$0xff]  }
   0x7   :  { %345 = vmatpush1.bf16.msra.mxu0 %v541_v7  ;;  %388 = vmatpush1.bf16.msra.mxu1 %v542_v8  ;;  %v559_v19 = vld [vmem:[%s804_s2 + $0x60] ss:$16 sps:$4 sm:$0xff]   ;;  %v560_v20 = vld [vmem:[%s804_s2 + $0x68] ss:$16 sps:$4 sm:$0xff]   ;;  %v561_v21 = vld [vmem:[%s804_s2 + $0x44] ss:$16 sps:$4 sm:$0xff]  }
   0x8   :  { %346 = vmatprep.subr.bf16.mxu0 %v543_v9  ;;  %389 = vmatprep.subr.bf16.mxu1 %v545_v10  ;;  %v563_v22 = vld [vmem:[%s804_s2 + $0x4c] ss:$16 sps:$4 sm:$0xff]   ;;  %v565_v23 = vld [vmem:[%s804_s2 + $0x40] ss:$16 sps:$4 sm:$0xff]   ;;  %v566_v24 = vld [vmem:[%s804_s2 + $0x48] ss:$16 sps:$4 sm:$0xff]  }
   0x9   :  { %v567_v25 = vld [vmem:[%s804_s2 + $0x24] ss:$16 sps:$4 sm:$0xff]   ;;  %v569_v26 = vld [vmem:[%s804_s2 + $0x2c] ss:$16 sps:$4 sm:$0xff]   ;;  %v571_v27 = vld [vmem:[%s804_s2 + $0x20] ss:$16 sps:$4 sm:$0xff]  }
   0xa   :  { %v572_v28 = vld [vmem:[%s804_s2 + $0x28] ss:$16 sps:$4 sm:$0xff]   ;;  %v573_v29 = vld [vmem:[%s804_s2 + $0x4] ss:$16 sps:$4 sm:$0xff]   ;;  %v575_v30 = vld [vmem:[%s804_s2 + $0xc] ss:$16 sps:$4 sm:$0xff]  }
   0xb   :  { %347 = vmatpush1.bf16.msra.mxu0 %v547_v11  ;;  %390 = vmatpush1.bf16.msra.mxu1 %v548_v12  ;;  %v577_v31 = vld [vmem:[%s804_s2] ss:$16 sps:$4 sm:$0xff]   ;;  %v578_v32 = vld [vmem:[%s804_s2 + $0x8] ss:$16 sps:$4 sm:$0xff]   ;;  %v579_v33 = vld [vmem:[%s804_s2 + $0x184] ss:$16 sps:$4 sm:$0xff]  }
   0xc   :  { %348 = vmatprep.subr.bf16.mxu0 %v549_v13  ;;  %391 = vmatprep.subr.bf16.mxu1 %v551_v14  ;;  %v581_v34 = vld [vmem:[%s804_s2 + $0x18c] ss:$16 sps:$4 sm:$0xff]   ;;  %v583_v35 = vld [vmem:[%s804_s2 + $0x180] ss:$16 sps:$4 sm:$0xff]   ;;  %v584_v36 = vld [vmem:[%s804_s2 + $0x188] ss:$16 sps:$4 sm:$0xff]  }
   0xd   :  { %v585_v37 = vld [vmem:[%s804_s2 + $0x164] ss:$16 sps:$4 sm:$0xff]   ;;  %v587_v38 = vld [vmem:[%s804_s2 + $0x16c] ss:$16 sps:$4 sm:$0xff]   ;;  %v589_v40 = vld [vmem:[%s804_s2 + $0x160] ss:$16 sps:$4 sm:$0xff]  }
   0xe   :  { %v611_v39 = vld [vmem:[%s805_s0 + $0x4] ss:$8 sps:$4 sm:$0xff]   ;;  %v590_v41 = vld [vmem:[%s804_s2 + $0x168] ss:$16 sps:$4 sm:$0xff]   ;;  %v595_v45 = vld [vmem:[%s804_s2 + $0x140] ss:$16 sps:$4 sm:$0xff]  }
   0xf   :  { %349 = vmatpush1.bf16.msra.mxu0 %v553_v15  ;;  %392 = vmatpush1.bf16.msra.mxu1 %v554_v16  ;;  %v434_v42 = vld [vmem:[%s806_s1] sm:$0xff]  ;;  %v593_v44 = vld [vmem:[%s804_s2 + $0x14c] ss:$16 sps:$4 sm:$0xff]   ;;  %v596_v46 = vld [vmem:[%s804_s2 + $0x148] ss:$16 sps:$4 sm:$0xff]  }
  0x10   :  { %350 = vmatprep.subr.bf16.mxu0 %v555_v17  ;;  %393 = vmatprep.subr.bf16.mxu1 %v557_v18  ;;  %v591_v43 = vld [vmem:[%s804_s2 + $0x144] ss:$16 sps:$4 sm:$0xff]   ;;  %v435_v47 = vld [vmem:[%s806_s1 + $0x8] sm:$0xff]  ;;  %v601_v50 = vld [vmem:[%s804_s2 + $0x120] ss:$16 sps:$4 sm:$0xff]  }
  0x11   :  { %518 = vmatprep.mubr.msk.bf16.mxu0 %vm338_vm0, %v611_v39  ;;  %519 = vmatprep.mubr.msk.bf16.mxu1 %vm338_vm0, %v611_v39  ;;  %v597_v48 = vld [vmem:[%s804_s2 + $0x124] ss:$16 sps:$4 sm:$0xff]   ;;  %v599_v49 = vld [vmem:[%s804_s2 + $0x12c] ss:$16 sps:$4 sm:$0xff]   ;;  %v602_v51 = vld [vmem:[%s804_s2 + $0x128] ss:$16 sps:$4 sm:$0xff]  }
  0x12   :  { %438 = vperm.xlu0 %530, %v434_v42   ;;  %v603_v52 = vld [vmem:[%s804_s2 + $0x104] ss:$16 sps:$4 sm:$0xff]   ;;  %v605_v53 = vld [vmem:[%s804_s2 + $0x10c] ss:$16 sps:$4 sm:$0xff]   ;;  %v607_v54 = vld [vmem:[%s804_s2 + $0x100] ss:$16 sps:$4 sm:$0xff]  }
  0x13   :  { %351 = vmatpush1.bf16.msra.mxu0 %v559_v19  ;;  %394 = vmatpush1.bf16.msra.mxu1 %v560_v20  ;;  %v608_v55 = vld [vmem:[%s804_s2 + $0x108] ss:$16 sps:$4 sm:$0xff]  }
  0x14   :  { %352 = vmatprep.subr.bf16.mxu0 %v561_v21  ;;  %395 = vmatprep.subr.bf16.mxu1 %v563_v22  ;;  %v609_v56 = vld [vmem:[%s805_s0] ss:$8 sps:$4 sm:$0xff]  }
  0x16   :  { %443 = vperm.xlu0 %530, %v435_v47  }
  0x17   :  { %353 = vmatpush1.bf16.msra.mxu0 %v565_v23  ;;  %396 = vmatpush1.bf16.msra.mxu1 %v566_v24 }
  0x18   :  { %354 = vmatprep.subr.bf16.mxu0 %v567_v25  ;;  %397 = vmatprep.subr.bf16.mxu1 %v569_v26 }
  0x1b   :  { %355 = vmatpush1.bf16.msra.mxu0 %v571_v27  ;;  %398 = vmatpush1.bf16.msra.mxu1 %v572_v28 }
  0x1c   :  { %356 = vmatprep.subr.bf16.mxu0 %v573_v29  ;;  %399 = vmatprep.subr.bf16.mxu1 %v575_v30 }
  0x1f   :  { %357 = vmatpush1.bf16.msra.mxu0 %v577_v31  ;;  %400 = vmatpush1.bf16.msra.mxu1 %v578_v32 }
  0x20   :  { %364 = vmatprep.subr.bf16.mxu0 %v579_v33  ;;  %407 = vmatprep.subr.bf16.mxu1 %v581_v34 }
  0x23   :  { %365 = vmatpush2.bf16.msra.mxu0 %v583_v35  ;;  %408 = vmatpush2.bf16.msra.mxu1 %v584_v36 }
  0x24   :  { %366 = vmatprep.subr.bf16.mxu0 %v585_v37  ;;  %409 = vmatprep.subr.bf16.mxu1 %v587_v38 }
  0x27   :  { %367 = vmatpush2.bf16.msra.mxu0 %v589_v40  ;;  %410 = vmatpush2.bf16.msra.mxu1 %v590_v41 }
  0x28   :  { %368 = vmatprep.subr.bf16.mxu0 %v591_v43  ;;  %411 = vmatprep.subr.bf16.mxu1 %v593_v44 }
  0x2b   :  { %369 = vmatpush2.bf16.msra.mxu0 %v595_v45  ;;  %412 = vmatpush2.bf16.msra.mxu1 %v596_v46 }
  0x2c   :  { %370 = vmatprep.subr.bf16.mxu0 %v597_v48  ;;  %413 = vmatprep.subr.bf16.mxu1 %v599_v49 }
  0x2f   :  { %371 = vmatpush2.bf16.msra.mxu0 %v601_v50  ;;  %414 = vmatpush2.bf16.msra.mxu1 %v602_v51 }
  0x30   :  { %372 = vmatprep.subr.bf16.mxu0 %v603_v52  ;;  %415 = vmatprep.subr.bf16.mxu1 %v605_v53 }
  0x33   :  { %373 = vmatpush2.bf16.msra.mxu0 %v607_v54  ;;  %416 = vmatpush2.bf16.msra.mxu1 %v608_v55 }
  0x36   :  { %375 = vmatmul.mubr.bf16.vlgmr.msra.gmra.mxu0 %v609_v56  ;;  %418 = vmatmul.mubr.bf16.vlgmr.msra.gmra.mxu1 %v609_v56 }
  0x8d   :  { %v439_v61 = vpop.permute.xlu0 %438 }
  0x91   :  { %v444_v9 = vpop.permute.xlu0 %443 }
  0xf6   :  { %v376_v57 = vpop.f32.mrf.mxu0  ;;  %v419_v58 = vpop.f32.mrf.mxu1 }
  0xf8   :  { %v378_v59 = vpop.f32.mrf.mxu0  ;;  %v421_v60 = vpop.f32.mrf.mxu1 }
  0xf9   :  { %v428_v62 = vmax.f32 %v376_v57, %v378_v59  ;;  %v430_v63 = vmax.f32 %v419_v58, %v421_v60 }
  0xfa   :  { %v380_v0 = vpop.f32.mrf.mxu0  ;;  %v423_v1 = vpop.f32.mrf.mxu1 }
  0xfb   :  { %v432_v2 = vmax.f32 %v428_v62, %v430_v63 }
  0xfc   :  { %v382_v3 = vpop.f32.mrf.mxu0  ;;  %v425_v4 = vpop.f32.mrf.mxu1 }
  0xfd   :  { %v429_v5 = vmax.f32 %v380_v0, %v382_v3  ;;  %v431_v6 = vmax.f32 %v423_v1, %v425_v4  ;;  %v446_v7 = vadd.f32 %v439_v61, %v432_v2 }
  0xff   :  { %v433_v8 = vmax.f32 %v429_v5, %v431_v6  ;;  %v448_v11 = vmax.f32 %v446_v7, 0.0 }
 0x101   :  { %v447_v10 = vadd.f32 %v444_v9, %v433_v8 }
 0x103   :  { %v449_v12 = vmax.f32 %v447_v10, 0.0 }
 0x105   :  { %v527_v13 = vpack.c.bf16 %v449_v12, %v448_v11 }
 0x107   :  { %528 = vst [vmem:[%s807_s3] sm:$0xff] %v527_v13  }

// kernel: cnn_forward.5
= control target key start
LH: loop header
LB: loop body
LE: loop exit
PB: predicated region body
PF: predicated region fallthrough
CT: control target
= control target key end

     0   :  { %v994_v0 = vmov 0   ;;  %vm402_vm0 = vcmask 130048   ;;  %vm996_vm1 = vmmov 0   ;;  %vm636_vm2 = vcmask 654336   ;;  %s1300_s0 = inlined_call_operand.vmem [shape: bf16[400,128], index: 0, kind: input, shape index: {}]   ;;  %s1301_s1 = inlined_call_operand.vmem [shape: bf16[80,400], index: 1, kind: input, shape index: {}]   ;;  %s1302_s2 = inlined_call_operand.vmem [shape: f32[80,1], index: 2, kind: input, shape index: {}]   ;;  %s1303_s4 = inlined_call_operand.vmem [shape: f32[48,1], index: 4, kind: input, shape index: {}]   ;;  %s1304_s6 = inlined_call_operand.vmem [shape: f32[16,1], index: 6, kind: input, shape index: {}]   ;;  %s1305_s3 = inlined_call_operand.vmem [shape: bf16[48,80], index: 3, kind: input, shape index: {}]   ;;  %s1306_s5 = inlined_call_operand.vmem [shape: bf16[16,48], index: 5, kind: input, shape index: {}]   ;;  %s1307_s7 = inlined_call_operand.vmem [shape: f32[16,128], index: 7, kind: output, shape index: {}]  }
   0x1   :  { %491 = vmatprep.subr.bf16.mxu1 %v994_v0  ;;  %v935_v1 = vld [vmem:[%s1300_s0 + $0x78] sm:$0xff]   ;;  %933 = vset.pattern.permute.xlu0 %v994_v0  ;;  %v938_v4 = vld [vmem:[%s1300_s0 + $0x70] sm:$0xff]   ;;  %v941_v7 = vld [vmem:[%s1300_s0 + $0x68] sm:$0xff]   ;;  %vm731_vm3 = vcmask 392192  }
   0x2   :  { %v936_v2 = vld [vmem:[%s1300_s0 + $0xb8] sm:$0xff]   ;;  %934 = vset.pattern.permute.xlu1 %v994_v0  ;;  %840 = vmatprep.subr.bf16.mxu0 %v935_v1  ;;  %v939_v5 = vld [vmem:[%s1300_s0 + $0xb0] sm:$0xff]   ;;  %v942_v8 = vld [vmem:[%s1300_s0 + $0xa8] sm:$0xff]  }
   0x3   :  { %v937_v3 = vld [vmem:[%s1300_s0 + $0x38] sm:$0xff]   ;;  %492 = vmatpush1.bf16.msra.mxu1 %v936_v2  ;;  %v940_v6 = vld [vmem:[%s1300_s0 + $0x30] sm:$0xff]   ;;  %v943_v9 = vld [vmem:[%s1300_s0 + $0x28] sm:$0xff]  }
   0x4   :  { %841 = vmatpush3.bf16.msra.mxu0 %v937_v3  ;;  %493 = vmatprep.subr.bf16.mxu1 %v994_v0  ;;  %v944_v10 = vld [vmem:[%s1300_s0 + $0x60] sm:$0xff]   ;;  %v947_v13 = vld [vmem:[%s1300_s0 + $0x58] sm:$0xff]   ;;  %v950_v16 = vld [vmem:[%s1300_s0 + $0x50] sm:$0xff]  }
   0x5   :  { %842 = vmatprep.subr.bf16.mxu0 %v938_v4  ;;  %v945_v11 = vld [vmem:[%s1300_s0 + $0xa0] sm:$0xff]   ;;  %v948_v14 = vld [vmem:[%s1300_s0 + $0x98] sm:$0xff]   ;;  %v951_v17 = vld [vmem:[%s1300_s0 + $0x90] sm:$0xff]  }
   0x6   :  { %v946_v12 = vld [vmem:[%s1300_s0 + $0x20] sm:$0xff]   ;;  %v949_v15 = vld [vmem:[%s1300_s0 + $0x18] sm:$0xff]   ;;  %v952_v18 = vld [vmem:[%s1300_s0 + $0x10] sm:$0xff]  }
   0x7   :  { %494 = vmatpush1.bf16.msra.mxu1 %v939_v5  ;;  %v953_v19 = vld [vmem:[%s1300_s0 + $0x48] sm:$0xff]   ;;  %v956_v22 = vld [vmem:[%s1300_s0 + $0x40] sm:$0xff]   ;;  %v103_v34 = vld [vmem:[%s1302_s2 + $0x30] sm:$0xff] }
   0x8   :  { %843 = vmatpush3.bf16.msra.mxu0 %v940_v6  ;;  %495 = vmatprep.subr.bf16.mxu1 %v994_v0  ;;  %v954_v20 = vld [vmem:[%s1300_s0 + $0x88] sm:$0xff]   ;;  %v961_v23 = vld [vmem:[%s1301_s1 + $0x4] ss:$16 sps:$4 sm:$0xff]   ;;  %v959_v27 = vld [vmem:[%s1301_s1] ss:$16 sps:$4 sm:$0xff]  }
   0x9   :  { %844 = vmatprep.subr.bf16.mxu0 %v941_v7  ;;  %v955_v21 = vld [vmem:[%s1300_s0 + $0x8] sm:$0xff]   ;;  %v957_v24 = vld [vmem:[%s1300_s0 + $0x80] sm:$0xff]   ;;  %450 = vmatprep.mubr.bf16.mxu0 %v961_v23  ;;  %v104_v37 = vld [vmem:[%s1302_s2 + $0x38] sm:$0xff] }
   0xa   :  { %v965_v25 = vld [vmem:[%s1301_s1 + $0xc] ss:$16 sps:$4 sm:$0xff]   ;;  %v958_v26 = vld [vmem:[%s1300_s0] sm:$0xff]   ;;  %v963_v30 = vld [vmem:[%s1301_s1 + $0x8] ss:$16 sps:$4 sm:$0xff]   ;;  %139 = vperm.xlu1 %934, %v103_v34  }
   0xb   :  { %496 = vmatpush1.bf16.msra.mxu1 %v942_v8  ;;  %827 = vmatprep.mubr.msk.bf16.mxu1 %vm402_vm0, %v965_v25  ;;  %v962_v28 = vld [vmem:[%s1300_s0 + $0xc0] sm:$0xff]   ;;  %v969_v31 = vld [vmem:[%s1301_s1 + $0x2c] ss:$16 sps:$4 sm:$0xff]   ;;  %v971_v38 = vld [vmem:[%s1301_s1 + $0x28] ss:$16 sps:$4 sm:$0xff]  }
   0xc   :  { %845 = vmatpush3.bf16.msra.mxu0 %v943_v9  ;;  %497 = vmatprep.subr.bf16.mxu1 %v994_v0  ;;  %v966_v29 = vld [vmem:[%s1301_s1 + $0x24] ss:$16 sps:$4 sm:$0xff]   ;;  %v968_v33 = vld [vmem:[%s1301_s1 + $0x20] ss:$16 sps:$4 sm:$0xff]   ;;  %v106_v36 = vld [vmem:[%s1302_s2 + $0x48] sm:$0xff] }
   0xd   :  { %846 = vmatprep.subr.bf16.mxu0 %v944_v10  ;;  %v105_v32 = vld [vmem:[%s1302_s2 + $0x40] sm:$0xff]  ;;  %v975_v39 = vld [vmem:[%s1301_s1 + $0x4c] ss:$16 sps:$4 sm:$0xff]   ;;  %v99_v44 = vld [vmem:[%s1302_s2 + $0x10] sm:$0xff] }
   0xe   :  { %149 = vperm.xlu0 %933, %v105_v32   ;;  %v972_v35 = vld [vmem:[%s1301_s1 + $0x44] ss:$16 sps:$4 sm:$0xff]   ;;  %144 = vperm.xlu1 %934, %v104_v37   ;;  %v102_v41 = vld [vmem:[%s1302_s2 + $0x28] sm:$0xff]  ;;  %v974_v42 = vld [vmem:[%s1301_s1 + $0x40] ss:$16 sps:$4 sm:$0xff]  }
   0xf   :  { %498 = vmatpush1.bf16.msra.mxu1 %v945_v11  ;;  %v101_v40 = vld [vmem:[%s1302_s2 + $0x20] sm:$0xff]  ;;  %v100_v45 = vld [vmem:[%s1302_s2 + $0x18] sm:$0xff]  ;;  %v98_v49 = vld [vmem:[%s1302_s2 + $0x8] sm:$0xff] }
  0x10   :  { %847 = vmatpush3.bf16.msra.mxu0 %v946_v12  ;;  %499 = vmatprep.subr.bf16.mxu1 %v994_v0  ;;  %v978_v43 = vld [vmem:[%s1301_s1 + $0x64] ss:$16 sps:$4 sm:$0xff]   ;;  %v977_v46 = vld [vmem:[%s1301_s1 + $0x48] ss:$16 sps:$4 sm:$0xff]   ;;  %v981_v47 = vld [vmem:[%s1301_s1 + $0x6c] ss:$16 sps:$4 sm:$0xff]  }
  0x11   :  { %848 = vmatprep.subr.bf16.mxu0 %v947_v13  ;;  %v97_v48 = vld [vmem:[%s1302_s2] sm:$0xff]  ;;  %v590_v53 = vld [vmem:[%s1303_s4 + $0x28] sm:$0xff]  ;;  %v587_v56 = vld [vmem:[%s1303_s4 + $0x10] sm:$0xff] }
  0x12   :  { %154 = vperm.xlu0 %933, %v106_v36   ;;  %134 = vperm.xlu1 %934, %v102_v41   ;;  %v980_v50 = vld [vmem:[%s1301_s1 + $0x60] ss:$16 sps:$4 sm:$0xff]   ;;  %v984_v51 = vld [vmem:[%s1301_s1 + $0x84] ss:$16 sps:$4 sm:$0xff]   ;;  %v983_v54 = vld [vmem:[%s1301_s1 + $0x68] ss:$16 sps:$4 sm:$0xff]  }
  0x13   :  { %500 = vmatpush1.bf16.msra.mxu1 %v948_v14  ;;  %v589_v52 = vld [vmem:[%s1303_s4 + $0x20] sm:$0xff]  ;;  %v987_v55 = vld [vmem:[%s1301_s1 + $0x8c] ss:$16 sps:$4 sm:$0xff]   ;;  %v989_v61 = vld [vmem:[%s1301_s1 + $0x88] ss:$16 sps:$4 sm:$0xff]  }
  0x14   :  { %849 = vmatpush3.bf16.msra.mxu0 %v949_v15  ;;  %501 = vmatprep.subr.bf16.mxu1 %v994_v0  ;;  %v588_v57 = vld [vmem:[%s1303_s4 + $0x18] sm:$0xff]  ;;  %v986_v58 = vld [vmem:[%s1301_s1 + $0x80] ss:$16 sps:$4 sm:$0xff]   ;;  %v586_v60 = vld [vmem:[%s1303_s4 + $0x8] sm:$0xff] }
  0x15   :  { %850 = vmatprep.subr.bf16.mxu0 %v950_v16  ;;  %v585_v59 = vld [vmem:[%s1303_s4] sm:$0xff]  ;;  %v715_v63 = vld [vmem:[%s1304_s6 + $0x8] sm:$0xff] }
  0x16   :  { %129 = vperm.xlu0 %933, %v101_v40   ;;  %124 = vperm.xlu1 %934, %v100_v45   ;;  %v714_v62 = vld [vmem:[%s1304_s6] sm:$0xff] }
  0x17   :  { %502 = vmatpush1.bf16.msra.mxu1 %v951_v17 }
  0x18   :  { %851 = vmatpush3.bf16.msra.mxu0 %v952_v18  ;;  %503 = vmatprep.subr.bf16.mxu1 %v994_v0 }
  0x19   :  { %852 = vmatprep.subr.bf16.mxu0 %v953_v19 }
  0x1a   :  { %119 = vperm.xlu0 %933, %v99_v44   ;;  %114 = vperm.xlu1 %934, %v98_v49  }
  0x1b   :  { %504 = vmatpush1.bf16.msra.mxu1 %v954_v20 }
  0x1c   :  { %853 = vmatpush3.bf16.msra.mxu0 %v955_v21  ;;  %505 = vmatprep.subr.bf16.mxu1 %v994_v0 }
  0x1d   :  { %854 = vmatprep.subr.bf16.mxu0 %v956_v22 }
  0x1e   :  { %109 = vperm.xlu0 %933, %v97_v48   ;;  %618 = vperm.xlu1 %934, %v590_v53  }
  0x1f   :  { %506 = vmatpush1.bf16.msra.mxu1 %v957_v24 }
  0x20   :  { %855 = vmatpush3.bf16.msra.mxu0 %v958_v26  ;;  %521 = vmatprep.subr.bf16.mxu1 %v994_v0  ;;  %v995_v0 = vmov 0.0  }
  0x21   :  { %898 = vmatprep.subr.bf16.mxu0 %v995_v0 }
  0x22   :  { %613 = vperm.xlu0 %933, %v589_v52   ;;  %608 = vperm.xlu1 %934, %v588_v57  }
  0x23   :  { %451 = vmatmul.mubr.bf16.vlgmr.msra.gmra.mxu0 %v959_v27  ;;  %522 = vmatpush2.bf16.msra.mxu1 %v962_v28 }
  0x24   :  { %458 = vmatprep.mubr.bf16.mxu0 %v966_v29  ;;  %920 = vmatprep.subr.bf16.mxu1 %v995_v0 }
  0x26   :  { %524 = vmatmul.mubr.bf16.vlgmr.msra.gmra.mxu1 %v963_v30  ;;  %603 = vperm.xlu0 %933, %v587_v56  }
  0x27   :  { %828 = vmatprep.mubr.msk.bf16.mxu1 %vm402_vm0, %v969_v31  ;;  %598 = vperm.xlu1 %934, %v586_v60  }
  0x2a   :  { %593 = vperm.xlu0 %933, %v585_v59  }
  0x2b   :  { %459 = vmatmul.mubr.bf16.gmra.mxu0 %v968_v33  ;;  %723 = vperm.xlu1 %934, %v715_v63  }
  0x2c   :  { %466 = vmatprep.mubr.bf16.mxu0 %v972_v35 }
  0x2e   :  { %532 = vmatmul.mubr.bf16.gmra.mxu1 %v971_v38  ;;  %718 = vperm.xlu0 %933, %v714_v62  }
  0x2f   :  { %829 = vmatprep.mubr.msk.bf16.mxu1 %vm402_vm0, %v975_v39 }
  0x33   :  { %467 = vmatmul.mubr.bf16.gmra.mxu0 %v974_v42 }
  0x34   :  { %474 = vmatprep.mubr.bf16.mxu0 %v978_v43 }
  0x36   :  { %540 = vmatmul.mubr.bf16.gmra.mxu1 %v977_v46 }
  0x37   :  { %830 = vmatprep.mubr.msk.bf16.mxu1 %vm402_vm0, %v981_v47 }
  0x3b   :  { %475 = vmatmul.mubr.bf16.gmra.mxu0 %v980_v50 }
  0x3c   :  { %482 = vmatprep.mubr.bf16.mxu0 %v984_v51 }
  0x3e   :  { %548 = vmatmul.mubr.bf16.gmra.mxu1 %v983_v54 }
  0x3f   :  { %831 = vmatprep.mubr.msk.bf16.mxu1 %vm402_vm0, %v987_v55 }
  0x43   :  { %483 = vmatmul.mubr.bf16.gmra.mxu0 %v986_v58 }
  0x44   :  { %908 = vmatprep.mubr.msk.bf16.mxu0 %vm996_vm1, %v995_v0 }
  0x46   :  { %556 = vmatmul.mubr.bf16.gmra.mxu1 %v989_v61 }
  0x47   :  { %926 = vmatprep.mubr.msk.bf16.mxu1 %vm996_vm1, %v995_v0 }
  0x85   :  { %v140_v24 = vpop.permute.xlu1 %139 }
  0x89   :  { %v150_v27 = vpop.permute.xlu0 %149  ;;  %v145_v32 = vpop.permute.xlu1 %144 }
  0x8d   :  { %v155_v35 = vpop.permute.xlu0 %154  ;;  %v135_v42 = vpop.permute.xlu1 %134 }
  0x91   :  { %v130_v47 = vpop.permute.xlu0 %129  ;;  %v125_v58 = vpop.permute.xlu1 %124 }
  0x95   :  { %v120_v63 = vpop.permute.xlu0 %119 }
  0xe3   :  { %v1248_v1 = vpop.f32.mrf.mxu0 }
  0xe5   :  { %v1250_v2 = vpop.f32.mrf.mxu0 }
  0xe6   :  { %v1252_v3 = vpop.f32.mrf.mxu1 }
  0xe7   :  { %v1254_v4 = vpop.f32.mrf.mxu0 }
  0xe8   :  { %v527_v5 = vpop.f32.mrf.mxu1 }
  0xe9   :  { %v1256_v6 = vpop.f32.mrf.mxu0 }
  0xea   :  { %v1258_v7 = vpop.f32.mrf.mxu1 }
  0xeb   :  { %v862_v8 = vpop.f32.mrf.mxu0 }
  0xec   :  { %v530_v9 = vpop.f32.mrf.mxu1 }
  0xed   :  { %v863_v10 = vpop.f32.mrf.mxu0 }
  0xee   :  { %v1260_v11 = vpop.f32.mrf.mxu1  ;;  %v864_v5 = vadd.f32 %v863_v10, %v862_v8  ;;  %v110_v8 = vpop.permute.xlu0 %109 }
  0xef   :  { %v865_v12 = vpop.f32.mrf.mxu0 }
  0xf0   :  { %v535_v13 = vpop.f32.mrf.mxu1 }
  0xf1   :  { %v866_v14 = vpop.f32.mrf.mxu0 }
  0xf2   :  { %v1262_v15 = vpop.f32.mrf.mxu1  ;;  %v867_v59 = vadd.f32 %v866_v14, %v865_v12  ;;  %v858_v12 = vadd.f32 %v1250_v2, %v1248_v1  ;;  %v461_v14 = vadd.f32 %v864_v5, %v120_v63 }
  0xf3   :  { %v868_v16 = vpop.f32.mrf.mxu0 }
  0xf4   :  { %v538_v17 = vpop.f32.mrf.mxu1 }
  0xf5   :  { %v869_v18 = vpop.f32.mrf.mxu0 }
  0xf6   :  { %v541_v19 = vpop.f32.mrf.mxu1  ;;  %v870_v53 = vadd.f32 %v869_v18, %v868_v16 }
  0xf7   :  { %v871_v20 = vpop.f32.mrf.mxu0 }
  0xf8   :  { %v543_v21 = vpop.f32.mrf.mxu1  ;;  %v469_v9 = vadd.f32 %v870_v53, %v130_v47 }
  0xf9   :  { %v872_v22 = vpop.f32.mrf.mxu0 }
  0xfa   :  { %v544_v23 = vpop.f32.mrf.mxu1  ;;  %v873_v49 = vadd.f32 %v872_v22, %v871_v20  ;;  %v861_v20 = vadd.f32 %v1256_v6, %v1254_v4  ;;  %v464_v22 = vadd.f32 %v867_v59, %v125_v58  ;;  %v453_v6 = vadd.f32 %v858_v12, %v110_v8 }
  0xfb   :  { %v874_v25 = vpop.f32.mrf.mxu0 }
  0xfc   :  { %v546_v26 = vpop.f32.mrf.mxu1  ;;  %v472_v60 = vadd.f32 %v873_v49, %v135_v42 }
  0xfd   :  { %v875_v28 = vpop.f32.mrf.mxu0  ;;  %v542_v26 = vadd.f32 %v541_v19, %v469_v9 }
  0xfe   :  { %v549_v29 = vpop.f32.mrf.mxu1  ;;  %v876_v44 = vadd.f32 %v875_v28, %v874_v25  ;;  %v545_v16 = vadd.f32 %v544_v23, %v472_v60  ;;  %v115_v25 = vpop.permute.xlu1 %114  ;;  %v537_v28 = vadd.f32 %v1262_v15, %v464_v22  ;;  %v534_v23 = vadd.f32 %v1260_v11, %v461_v14 }
  0xff   :  { %v877_v30 = vpop.f32.mrf.mxu0  ;;  %v456_v10 = vadd.f32 %v861_v20, %v115_v25  ;;  %v993_v20 = vld [vmem:[%s1306_s5] sm:$0xff]  }
 0x100   :  { %v551_v31 = vpop.f32.mrf.mxu1  ;;  %v477_v54 = vadd.f32 %v876_v44, %v140_v24  ;;  %v567_v2 = vmax.f32 %v537_v28, 0.0  ;;  %v614_v44 = vpop.permute.xlu0 %613 }
 0x101   :  { %v878_v33 = vpop.f32.mrf.mxu0  ;;  %v529_v1 = vadd.f32 %v1258_v7, %v456_v10  ;;  %v526_v31 = vadd.f32 %v1252_v3, %v453_v6  ;;  %v991_v3 = vld [vmem:[%s1305_s3 + $0x8] sm:$0xff]   ;;  %v992_v7 = vld [vmem:[%s1305_s3 + $0x10] sm:$0xff]  }
 0x102   :  { %v552_v34 = vpop.f32.mrf.mxu1  ;;  %v879_v39 = vadd.f32 %v878_v33, %v877_v30  ;;  %v550_v13 = vadd.f32 %v549_v29, %v477_v54  ;;  %v569_v29 = vmax.f32 %v545_v16, 0.0  ;;  %v568_v30 = vmax.f32 %v542_v26, 0.0  ;;  %v619_v42 = vpop.permute.xlu1 %618 }
 0x103   :  { %v880_v36 = vpop.f32.mrf.mxu0  ;;  %v565_v15 = vmax.f32 %v529_v1, 0.0 }
 0x104   :  { %v554_v37 = vpop.f32.mrf.mxu1  ;;  %v480_v50 = vadd.f32 %v879_v39, %v145_v32  ;;  %v576_v19 = vpack.c.bf16 %v569_v29, %v568_v30  ;;  %v566_v32 = vmax.f32 %v534_v23, 0.0 }
 0x105   :  { %v881_v38 = vpop.f32.mrf.mxu0 }
 0x106   :  { %v882_v40 = vadd.f32 %v881_v38, %v880_v36  ;;  %v557_v41 = vpop.f32.mrf.mxu1  ;;  %v553_v61 = vadd.f32 %v552_v34, %v480_v50  ;;  %v575_v33 = vpack.c.bf16 %v567_v2, %v566_v32  ;;  %v564_v34 = vmax.f32 %v526_v31, 0.0  ;;  %v609_v47 = vpop.permute.xlu1 %608 }
 0x107   :  { %v883_v43 = vpop.f32.mrf.mxu0  ;;  %v604_v50 = vpop.permute.xlu0 %603 }
 0x108   :  { %v485_v45 = vadd.f32 %v882_v40, %v150_v27  ;;  %v559_v46 = vpop.f32.mrf.mxu1  ;;  %v571_v18 = vmax.f32 %v553_v61, 0.0  ;;  %v570_v27 = vmax.f32 %v550_v13, 0.0  ;;  %v574_v11 = vpack.c.bf16 %v565_v15, %v564_v34 }
 0x109   :  { %v884_v48 = vpop.f32.mrf.mxu0 }
 0x10a   :  { %v885_v51 = vadd.f32 %v884_v48, %v883_v43  ;;  %v560_v52 = vpop.f32.mrf.mxu1  ;;  %v558_v55 = vadd.f32 %v557_v41, %v485_v45  ;;  %v577_v4 = vpack.c.bf16 %v571_v18, %v570_v27  ;;  %v599_v58 = vpop.permute.xlu1 %598 }
 0x10c   :  { %v488_v56 = vadd.f32 %v885_v51, %v155_v35  ;;  %v562_v57 = vpop.f32.mrf.mxu1  ;;  %v572_v17 = vmax.f32 %v558_v55, 0.0  ;;  %v990_v35 = vld [vmem:[%s1305_s3] sm:$0xff]  }
 0x10e   :  { %v561_v62 = vadd.f32 %v560_v52, %v488_v56  ;;  %v724_v25 = vpop.permute.xlu1 %723 }
 0x110   :  { %v573_v21 = vmax.f32 %v561_v62, 0.0  ;;  %v594_v62 = vpop.permute.xlu0 %593 }
 0x112   :  { %v578_v24 = vpack.c.bf16 %v573_v21, %v572_v17 }
 0x114   :  { %899 = vmatpush3.bf16.msra.mxu0 %v578_v24  ;;  %v719_v22 = vpop.permute.xlu0 %718 }
 0x115   :  { %900 = vmatprep.subr.bf16.mxu0 %v995_v0 }
 0x118   :  { %901 = vmatpush3.bf16.msra.mxu0 %v577_v4 }
 0x119   :  { %902 = vmatprep.subr.bf16.mxu0 %v995_v0 }
 0x11c   :  { %903 = vmatpush3.bf16.msra.mxu0 %v576_v19 }
 0x11d   :  { %904 = vmatprep.subr.bf16.mxu0 %v995_v0 }
 0x120   :  { %905 = vmatpush3.bf16.msra.mxu0 %v575_v33 }
 0x121   :  { %906 = vmatprep.subr.bf16.mxu0 %v995_v0 }
 0x124   :  { %907 = vmatpush3.bf16.msra.mxu0 %v574_v11 }
 0x127   :  { %909 = vmatmul.mubr.msk.bf16.vlgmr.msra.gmra.mxu0 %vm636_vm2, %v990_v35 }
 0x128   :  { %912 = vmatprep.mubr.msk.bf16.mxu0 %vm996_vm1, %v995_v0 }
 0x12f   :  { %913 = vmatmul.mubr.msk.bf16.gmra.mxu0 %vm636_vm2, %v991_v3 }
 0x130   :  { %916 = vmatprep.mubr.msk.bf16.mxu0 %vm996_vm1, %v995_v0 }
 0x137   :  { %917 = vmatmul.mubr.msk.bf16.gmra.mxu0 %vm636_vm2, %v992_v7 }
 0x1e7   :  { %v680_v36 = vpop.f32.mrf.mxu0 }
 0x1e8   :  { %v681_v63 = vadd.f32 %v680_v36, %v594_v62 }
 0x1e9   :  { %v910_v37 = vpop.f32.mrf.mxu0 }
 0x1ea   :  { %v703_v17 = vmax.f32 %v681_v63, 0.0 }
 0x1eb   :  { %v683_v38 = vpop.f32.mrf.mxu0 }
 0x1ec   :  { %v684_v59 = vadd.f32 %v683_v38, %v599_v58 }
 0x1ed   :  { %v911_v39 = vpop.f32.mrf.mxu0 }
 0x1ee   :  { %v704_v9 = vmax.f32 %v684_v59, 0.0 }
 0x1ef   :  { %v688_v40 = vpop.f32.mrf.mxu0 }
 0x1f0   :  { %v689_v55 = vadd.f32 %v688_v40, %v604_v50  ;;  %v709_v21 = vpack.c.bf16 %v704_v9, %v703_v17 }
 0x1f1   :  { %v914_v41 = vpop.f32.mrf.mxu0 }
 0x1f2   :  { %v705_v5 = vmax.f32 %v689_v55, 0.0 }
 0x1f3   :  { %v691_v43 = vpop.f32.mrf.mxu0 }
 0x1f4   :  { %v692_v52 = vadd.f32 %v691_v43, %v609_v47 }
 0x1f5   :  { %v915_v45 = vpop.f32.mrf.mxu0 }
 0x1f6   :  { %v706_v60 = vmax.f32 %v692_v52, 0.0 }
 0x1f7   :  { %v696_v46 = vpop.f32.mrf.mxu0 }
 0x1f8   :  { %v697_v49 = vadd.f32 %v696_v46, %v614_v44  ;;  %v710_v13 = vpack.c.bf16 %v706_v60, %v705_v5 }
 0x1f9   :  { %v918_v48 = vpop.f32.mrf.mxu0 }
 0x1fa   :  { %v707_v56 = vmax.f32 %v697_v49, 0.0 }
 0x1fb   :  { %v699_v51 = vpop.f32.mrf.mxu0 }
 0x1fc   :  { %v700_v53 = vadd.f32 %v699_v51, %v619_v42 }
 0x1fd   :  { %v919_v54 = vpop.f32.mrf.mxu0 }
 0x1fe   :  { %v708_v57 = vmax.f32 %v700_v53, 0.0 }
 0x200   :  { %v711_v61 = vpack.c.bf16 %v708_v57, %v707_v56 }
 0x202   :  { %921 = vmatpush3.bf16.msra.mxu1 %v711_v61 }
 0x203   :  { %922 = vmatprep.subr.bf16.mxu1 %v995_v0 }
 0x206   :  { %923 = vmatpush3.bf16.msra.mxu1 %v710_v13 }
 0x207   :  { %924 = vmatprep.subr.bf16.mxu1 %v995_v0 }
 0x20a   :  { %925 = vmatpush3.bf16.msra.mxu1 %v709_v21 }
 0x20d   :  { %927 = vmatmul.mubr.msk.bf16.vlgmr.msra.gmra.mxu1 %vm731_vm3, %v993_v20 }
 0x2cd   :  { %v769_v16 = vpop.f32.mrf.mxu1 }
 0x2ce   :  { %v770_v18 = vadd.f32 %v769_v16, %v719_v22 }
 0x2cf   :  { %v928_v24 = vpop.f32.mrf.mxu1 }
 0x2d0   :  { %776 = vst [vmem:[%s1307_s7] sm:$0xff] %v770_v18 }
 0x2d1   :  { %v772_v12 = vpop.f32.mrf.mxu1 }
 0x2d2   :  { %v773_v14 = vadd.f32 %v772_v12, %v724_v25 }
 0x2d3   :  { %v929_v0 = vpop.f32.mrf.mxu1 }
 0x2d4   :  { %777 = vst [vmem:[%s1307_s7 + $0x8] sm:$0xff] %v773_v14 }

</bundles_post_ra>
